<compile_context>
chip_gen: v7x
topology: tpu7x:2x2x1
jax: 0.10.0
libtpu: 0.0.40
codegen_flags: <defaults>
</compile_context>

<pallas_src>
import functools

import jax
import jax.numpy as jnp
from jax import lax
from jax.experimental import pallas as pl
from jax.experimental.pallas import tpu as pltpu


def _mdc_kernel(x_ref, w1_ref, bnp_ref, wtri_ref, out_ref, s_ref, *,
                dilations, img_w, left_pad):
    """Process one image (grid iterates over batch).

    x_ref    : [1, Cin, HW] f32   input, spatial flattened into lanes
    w1_ref   : [n, Cin]     bf16  1x1 conv weight (out, in)
    bnp_ref  : [n, 3]       f32   columns = (bn_scale, bn_shift, prelu_slope)
    wtri_ref : [K, K*n, 9n] bf16  block-lower-triangular column weights
                                  (9n axis ordered (kx, ky, cin))
    out_ref  : [1, K*n, HW] f32   output (channels in sublanes, lane-dense)
    s_ref    : [n, L] f32 VMEM    1-D zero-padded activation scratch
    """
    _, Cin, HW = x_ref.shape
    n = w1_ref.shape[0]
    K = wtri_ref.shape[0]
    Kn = wtri_ref.shape[1]
    L = s_ref.shape[1]
    W = img_w

    # ---- proj_1x1: 1x1 conv == matmul over channels (bf16 MXU operands,
    #      f32 accumulation), then folded BatchNorm + PReLU on the VPU ----
    t = jnp.dot(w1_ref[...], x_ref[0].astype(jnp.bfloat16),
                preferred_element_type=jnp.float32)            # [n, HW] f32
    scale = bnp_ref[:, 0:1]
    shift = bnp_ref[:, 1:2]
    slope = bnp_ref[:, 2:3]
    t = t * scale + shift
    t = jnp.where(t > 0, t, slope * t)

    # ---- 1-D padded activation: zero the small halo borders, then one
    #      dense lane-aligned interior store.  (Zeroed every step: scratch is
    #      per-core under "parallel" sharding, so a program_id==0 gate would
    #      be unsafe; the borders are < 2 vregs anyway.) ----
    s_ref[:, 0:left_pad] = jnp.zeros((n, left_pad), jnp.float32)
    s_ref[:, left_pad + HW:L] = jnp.zeros((n, L - left_pad - HW), jnp.float32)
    s_ref[:, left_pad:left_pad + HW] = t

    # Column index of every flattened pixel (for horizontal wrap masks).
    col = lax.broadcasted_iota(jnp.int32, (1, HW), 1) % W       # [1, HW]

    # ---- K dilated 3x3 convs + running sum, fused into K MXU dots with the
    #      block-lower-triangular weights; single dense output write ----
    acc = jnp.zeros((Kn, HW), jnp.float32)
    for b in range(K):
        d = dilations[b]                                        # static int
        m_lo = col >= d            # column shift -d stays inside the row
        m_hi = col < (W - d)       # column shift +d stays inside the row
        groups = []
        for kx in range(3):
            dx = (kx - 1) * d
            parts = []
            for ky in range(3):
                start = left_pad + (ky - 1) * d * W + dx        # static offset
                parts.append(s_ref[:, start:start + HW])        # [n, HW]
            g = jnp.concatenate(parts, axis=0)                  # [3n, HW]
            if dx < 0:
                g = jnp.where(m_lo, g, 0.0)                     # one mask / group
            elif dx > 0:
                g = jnp.where(m_hi, g, 0.0)
            groups.append(g)
        pstack = jnp.concatenate(groups, axis=0)                # [9n, HW]
        # wtri_ref[b] row-block r equals W_b for r >= b, else 0  ->  this dot
        # adds conv_b to every output block r >= b, i.e. the running sum.
        acc = acc + jnp.dot(wtri_ref[b], pstack.astype(jnp.bfloat16),
                            preferred_element_type=jnp.float32)

    out_ref[0, :, :] = acc.astype(out_ref.dtype)


def mdc_forward(x_nchw, params, *, dilations):
    """MDC forward.  x_nchw: [N, Cin, H, W] float32 -> [N, K*n, H, W]."""
    w1, bn_scale, bn_shift, prelu_a, wdw = params
    N, Cin, H, W = x_nchw.shape
    n = w1.shape[0]
    K = wdw.shape[0]
    P = max(dilations)
    assert P < W, "mask logic assumes max(dilation) < image width"
    HW = H * W

    # 1-D padded scratch geometry: pad by P rows (+P extra elements) on each
    # side; round the left pad up to a multiple of 128 so the interior write
    # is lane-aligned.  Tap reads at left_pad + dy*W + dx always stay in [0, L).
    halo = P * W + P
    left_pad = ((halo + 127) // 128) * 128
    L = left_pad + HW + halo

    x_flat = x_nchw.reshape(N, Cin, HW)              # free reshape, no transpose
    w1_b = w1.astype(jnp.bfloat16)                   # [n, Cin] bf16
    bnp = jnp.stack([bn_scale, bn_shift, prelu_a], axis=1)     # [n, 3] f32

    # Dilated weights -> 2-D lane-dense, (kx, ky, cin) along contraction,
    # then block-lower-triangular column blocks that fold the running sum:
    #   wtri[j] : [K*n, 9n], row block b = W_j if b >= j else 0.
    w2 = jnp.transpose(wdw, (0, 1, 4, 3, 2)).reshape(K, n, 9 * n)   # [K, n, 9n]
    zeros_blk = jnp.zeros((n, 9 * n), w2.dtype)
    wtri = jnp.stack(
        [jnp.concatenate([w2[j] if b >= j else zeros_blk for b in range(K)],
                         axis=0)
         for j in range(K)], axis=0).astype(jnp.bfloat16)           # [K, K*n, 9n]

    kernel = functools.partial(_mdc_kernel, dilations=tuple(dilations),
                               img_w=W, left_pad=left_pad)

    flops = 2 * N * HW * (Cin * n + K * (K * n) * (9 * n))
    bytes_accessed = (4 * (x_flat.size + N * K * n * HW + bnp.size)
                      + 2 * (w1_b.size + wtri.size))

    out_flat = pl.pallas_call(
        kernel,
        out_shape=jax.ShapeDtypeStruct((N, K * n, HW), jnp.float32),
        grid_spec=pltpu.PrefetchScalarGridSpec(
            num_scalar_prefetch=0,
            grid=(N,),
            in_specs=[
                pl.BlockSpec((1, Cin, HW), lambda i: (i, 0, 0)),
                pl.BlockSpec((n, Cin), lambda i: (0, 0)),
                pl.BlockSpec((n, 3), lambda i: (0, 0)),
                pl.BlockSpec((K, K * n, 9 * n), lambda i: (0, 0, 0)),
            ],
            out_specs=pl.BlockSpec((1, K * n, HW), lambda i: (i, 0, 0)),
            scratch_shapes=[pltpu.VMEM((n, L), jnp.float32)],
        ),
        compiler_params=pltpu.CompilerParams(
            dimension_semantics=("parallel",)),
        cost_estimate=pl.CostEstimate(flops=int(flops), transcendentals=0,
                                      bytes_accessed=int(bytes_accessed)),
    )(x_flat, w1_b, bnp, wtri)

    return out_flat.reshape(N, K * n, H, W)


def mdc_reference(x_nchw, params, *, dilations):
    """Pure-JAX f32 reference (for correctness check only)."""
    w1, bn_scale, bn_shift, prelu_a, wdw = params
    x = jnp.transpose(x_nchw, (0, 2, 3, 1))                    # NHWC
    t = jnp.einsum('nhwc,dc->nhwd', x, w1)
    t = t * bn_scale + bn_shift
    t = jnp.where(t > 0, t, prelu_a * t)
    outs, prev = [], None
    for b, d in enumerate(dilations):
        w_hwio = jnp.transpose(wdw[b], (2, 3, 1, 0))           # [3,3,in,out]
        y = lax.conv_general_dilated(
            t, w_hwio, window_strides=(1, 1), padding=[(d, d), (d, d)],
            rhs_dilation=(d, d),
            dimension_numbers=('NHWC', 'HWIO', 'NHWC'))
        prev = y if prev is None else y + prev
        outs.append(prev)
    return jnp.transpose(jnp.concatenate(outs, axis=-1), (0, 3, 1, 2))


def make_params(key, nIn, nOut, k):
    """Deterministic synthetic parameters matching MDC.__init__ shapes."""
    n = nOut // k
    ks = jax.random.split(key, 6)
    # proj_1x1 conv weight: torch shape [n, nIn, 1, 1] -> stored as [n, nIn]
    w1 = 0.3 * jax.random.normal(ks[0], (n, nIn), jnp.float32)
    # BatchNorm2d(n) eval-mode params folded to scale/shift
    gamma = 1.0 + 0.1 * jax.random.normal(ks[1], (n,), jnp.float32)
    beta = 0.1 * jax.random.normal(ks[2], (n,), jnp.float32)
    run_mean = 0.1 * jax.random.normal(ks[3], (n,), jnp.float32)
    run_var = jnp.abs(jax.random.normal(ks[4], (n,), jnp.float32)) + 0.5
    eps = 1e-5
    bn_scale = gamma / jnp.sqrt(run_var + eps)
    bn_shift = beta - run_mean * bn_scale
    # PReLU(n): per-channel negative slope (torch init = 0.25)
    prelu_a = jnp.full((n,), 0.25, jnp.float32)
    # k dilated 3x3 convs: torch shape [n, n, 3, 3] each -> [k, out, in, 3, 3]
    wdw = 0.2 * jax.random.normal(ks[5], (k, n, n, 3, 3), jnp.float32)
    return (w1, bn_scale, bn_shift, prelu_a, wdw)


if __name__ == "__main__":
    # Small shapes consistent with MDC: nIn=4, nOut=16, k=4 -> n=4,
    # k_sizes=[3,5,7,9] -> dilations [1,2,3,4], stride=1.
    N, nIn, H, W = 2, 4, 16, 16
    nOut, k = 16, 4
    dilations = (1, 2, 3, 4)

    key = jax.random.PRNGKey(0)
    kx, kp = jax.random.split(key)
    x = jax.random.normal(kx, (N, nIn, H, W), jnp.float32)
    params = make_params(kp, nIn, nOut, k)

    mdc_fn = jax.jit(functools.partial(mdc_forward, dilations=dilations))
    out = mdc_fn(x, params)
    out = jax.block_until_ready(out)

    ref = mdc_reference(x, params, dilations=dilations)
    assert out.shape == (N, nOut, H, W), out.shape
    # Tolerance accounts for bf16 MXU operands (f32 accumulation) vs the
    # pure-f32 reference; observed max |err| is ~1e-2 at these shapes.
    assert jnp.allclose(out, ref, atol=3e-2, rtol=3e-2), (
        float(jnp.max(jnp.abs(out - ref))))

    print("KERNEL_OK")
</pallas_src>

<mosaic_0001>
module attributes {stable_mosaic.version = 11 : i64} {
  func.func @_mdc_kernel(%arg0: i32, %arg1: memref<1x4x256xf32, #tpu.memory_space<vmem>>, %arg2: memref<4x4xbf16, #tpu.memory_space<vmem>>, %arg3: memref<4x3xf32, #tpu.memory_space<vmem>>, %arg4: memref<4x16x36xbf16, #tpu.memory_space<vmem>>, %arg5: memref<1x16x256xf32, #tpu.memory_space<vmem>>, %arg6: memref<4x452xf32, #tpu.memory_space<vmem>>) attributes {dimension_semantics = [#tpu.dimension_semantics<parallel>], iteration_bounds = array<i64: 2>, scalar_prefetch = 0 : i64, scratch_operands = 1 : i64, tpu.core_type = #tpu.core_type<tc>, window_params = [{transform_indices = @transform_0, window_bounds = array<i64: 1, 4, 256>}, {pipeline_mode = #tpu.pipeline_mode<synchronous>, transform_indices = @transform_1, window_bounds = array<i64: 4, 4>}, {pipeline_mode = #tpu.pipeline_mode<synchronous>, transform_indices = @transform_2, window_bounds = array<i64: 4, 3>}, {pipeline_mode = #tpu.pipeline_mode<synchronous>, transform_indices = @transform_3, window_bounds = array<i64: 4, 16, 36>}, {transform_indices = @transform_4, window_bounds = array<i64: 1, 16, 256>}]} {
    %c0 = arith.constant 0 : index
    %c0_0 = arith.constant 0 : index
    %0 = vector.load %arg2[%c0, %c0_0] : memref<4x4xbf16, #tpu.memory_space<vmem>>, vector<4x4xbf16>
    %c0_1 = arith.constant 0 : index
    %c0_2 = arith.constant 0 : index
    %c0_3 = arith.constant 0 : index
    %1 = vector.load %arg1[%c0_1, %c0_2, %c0_3] : memref<1x4x256xf32, #tpu.memory_space<vmem>>, vector<1x4x256xf32>
    %2 = vector.shape_cast %1 : vector<1x4x256xf32> to vector<4x256xf32>
    %3 = arith.truncf %2 : vector<4x256xf32> to vector<4x256xbf16>
    %cst = arith.constant dense<0.000000e+00> : vector<4x256xf32>
    %4 = tpu.matmul %0, %3, %cst {dimension_numbers = #tpu.dot_dimension_numbers<[1], [0], [0], [1], [0, 0, 1, 1], [], []>} : vector<4x4xbf16>, vector<4x256xbf16>, vector<4x256xf32> -> vector<4x256xf32>
    %c0_4 = arith.constant 0 : index
    %c0_5 = arith.constant 0 : index
    %5 = vector.load %arg3[%c0_4, %c0_5] : memref<4x3xf32, #tpu.memory_space<vmem>>, vector<4x1xf32>
    %c0_6 = arith.constant 0 : index
    %c1 = arith.constant 1 : index
    %6 = vector.load %arg3[%c0_6, %c1] : memref<4x3xf32, #tpu.memory_space<vmem>>, vector<4x1xf32>
    %c0_7 = arith.constant 0 : index
    %c2 = arith.constant 2 : index
    %7 = vector.load %arg3[%c0_7, %c2] : memref<4x3xf32, #tpu.memory_space<vmem>>, vector<4x1xf32>
    %8 = vector.broadcast %5 : vector<4x1xf32> to vector<4x256xf32>
    %9 = arith.mulf %4, %8 : vector<4x256xf32>
    %10 = vector.broadcast %6 : vector<4x1xf32> to vector<4x256xf32>
    %11 = arith.addf %9, %10 : vector<4x256xf32>
    %cst_8 = arith.constant 0.000000e+00 : f32
    %12 = vector.broadcast %cst_8 : f32 to vector<4x256xf32>
    %13 = arith.cmpf ogt, %11, %12 : vector<4x256xf32>
    %14 = vector.broadcast %7 : vector<4x1xf32> to vector<4x256xf32>
    %15 = arith.mulf %14, %11 : vector<4x256xf32>
    %16 = arith.select %13, %11, %15 : vector<4x256xi1>, vector<4x256xf32>
    %cst_9 = arith.constant 0.000000e+00 : f32
    %17 = vector.broadcast %cst_9 : f32 to vector<4x128xf32>
    %c0_10 = arith.constant 0 : index
    %c0_11 = arith.constant 0 : index
    %18 = vector.load %arg6[%c0_10, %c0_11] : memref<4x452xf32, #tpu.memory_space<vmem>>, vector<4x128xf32>
    tpu.vector_store %arg6[%c0_10, %c0_11], %17 {strides = array<i32>} : memref<4x452xf32, #tpu.memory_space<vmem>>, vector<4x128xf32>,
    %cst_12 = arith.constant 0.000000e+00 : f32
    %19 = vector.broadcast %cst_12 : f32 to vector<4x68xf32>
    %c0_13 = arith.constant 0 : index
    %c384 = arith.constant 384 : index
    %20 = vector.load %arg6[%c0_13, %c384] : memref<4x452xf32, #tpu.memory_space<vmem>>, vector<4x68xf32>
    tpu.vector_store %arg6[%c0_13, %c384], %19 {strides = array<i32>} : memref<4x452xf32, #tpu.memory_space<vmem>>, vector<4x68xf32>,
    %c0_14 = arith.constant 0 : index
    %c128 = arith.constant 128 : index
    %21 = vector.load %arg6[%c0_14, %c128] : memref<4x452xf32, #tpu.memory_space<vmem>>, vector<4x256xf32>
    tpu.vector_store %arg6[%c0_14, %c128], %16 {strides = array<i32>} : memref<4x452xf32, #tpu.memory_space<vmem>>, vector<4x256xf32>,
    %22 = tpu.iota {dimensions = array<i32: 1>} : vector<1x256xi32>
    %c16_i32 = arith.constant 16 : i32
    %c0_i32 = arith.constant 0 : i32
    %23 = arith.cmpi eq, %c16_i32, %c0_i32 : i32
    %c1_i32 = arith.constant 1 : i32
    %24 = arith.select %23, %c1_i32, %c16_i32 : i32
    %25 = vector.broadcast %24 : i32 to vector<1x256xi32>
    %26 = arith.remsi %22, %25 : vector<1x256xi32>
    %c0_i32_15 = arith.constant 0 : i32
    %27 = vector.broadcast %c0_i32_15 : i32 to vector<1x256xi32>
    %28 = arith.cmpi ne, %26, %27 : vector<1x256xi32>
    %c0_i32_16 = arith.constant 0 : i32
    %29 = vector.broadcast %c0_i32_16 : i32 to vector<1x256xi32>
    %30 = arith.cmpi slt, %26, %29 : vector<1x256xi32>
    %c0_i32_17 = arith.constant 0 : i32
    %31 = arith.cmpi slt, %24, %c0_i32_17 : i32
    %32 = vector.broadcast %31 : i1 to vector<1x256xi1>
    %33 = vector.broadcast %32 : vector<1x256xi1> to vector<1x256xi1>
    %34 = arith.xori %30, %33 : vector<1x256xi1>
    %35 = arith.andi %34, %28 : vector<1x256xi1>
    %36 = vector.broadcast %24 : i32 to vector<1x256xi32>
    %37 = arith.addi %26, %36 : vector<1x256xi32>
    %38 = arith.select %35, %37, %26 : vector<1x256xi1>, vector<1x256xi32>
    %cst_18 = arith.constant 0.000000e+00 : f32
    %39 = vector.broadcast %cst_18 : f32 to vector<16x256xf32>
    %c1_i32_19 = arith.constant 1 : i32
    %40 = vector.broadcast %c1_i32_19 : i32 to vector<1x256xi32>
    %41 = arith.cmpi sge, %38, %40 : vector<1x256xi32>
    %c15_i32 = arith.constant 15 : i32
    %42 = vector.broadcast %c15_i32 : i32 to vector<1x256xi32>
    %43 = arith.cmpi slt, %38, %42 : vector<1x256xi32>
    %c0_20 = arith.constant 0 : index
    %c111 = arith.constant 111 : index
    %44 = vector.load %arg6[%c0_20, %c111] : memref<4x452xf32, #tpu.memory_space<vmem>>, vector<4x256xf32>
    %c0_21 = arith.constant 0 : index
    %c127 = arith.constant 127 : index
    %45 = vector.load %arg6[%c0_21, %c127] : memref<4x452xf32, #tpu.memory_space<vmem>>, vector<4x256xf32>
    %c0_22 = arith.constant 0 : index
    %c143 = arith.constant 143 : index
    %46 = vector.load %arg6[%c0_22, %c143] : memref<4x452xf32, #tpu.memory_space<vmem>>, vector<4x256xf32>
    %47 = tpu.concatenate %44, %45, %46 in 0 : vector<4x256xf32>, vector<4x256xf32>, vector<4x256xf32> -> vector<12x256xf32>
    %cst_23 = arith.constant 0.000000e+00 : f32
    %48 = vector.shape_cast %41 : vector<1x256xi1> to vector<1x256xi1>
    %49 = vector.broadcast %48 : vector<1x256xi1> to vector<12x256xi1>
    %50 = vector.broadcast %cst_23 : f32 to vector<12x256xf32>
    %51 = arith.select %49, %47, %50 : vector<12x256xi1>, vector<12x256xf32>
    %c0_24 = arith.constant 0 : index
    %c112 = arith.constant 112 : index
    %52 = vector.load %arg6[%c0_24, %c112] : memref<4x452xf32, #tpu.memory_space<vmem>>, vector<4x256xf32>
    %c0_25 = arith.constant 0 : index
    %c128_26 = arith.constant 128 : index
    %53 = vector.load %arg6[%c0_25, %c128_26] : memref<4x452xf32, #tpu.memory_space<vmem>>, vector<4x256xf32>
    %c0_27 = arith.constant 0 : index
    %c144 = arith.constant 144 : index
    %54 = vector.load %arg6[%c0_27, %c144] : memref<4x452xf32, #tpu.memory_space<vmem>>, vector<4x256xf32>
    %55 = tpu.concatenate %52, %53, %54 in 0 : vector<4x256xf32>, vector<4x256xf32>, vector<4x256xf32> -> vector<12x256xf32>
    %c0_28 = arith.constant 0 : index
    %c113 = arith.constant 113 : index
    %56 = vector.load %arg6[%c0_28, %c113] : memref<4x452xf32, #tpu.memory_space<vmem>>, vector<4x256xf32>
    %c0_29 = arith.constant 0 : index
    %c129 = arith.constant 129 : index
    %57 = vector.load %arg6[%c0_29, %c129] : memref<4x452xf32, #tpu.memory_space<vmem>>, vector<4x256xf32>
    %c0_30 = arith.constant 0 : index
    %c145 = arith.constant 145 : index
    %58 = vector.load %arg6[%c0_30, %c145] : memref<4x452xf32, #tpu.memory_space<vmem>>, vector<4x256xf32>
    %59 = tpu.concatenate %56, %57, %58 in 0 : vector<4x256xf32>, vector<4x256xf32>, vector<4x256xf32> -> vector<12x256xf32>
    %cst_31 = arith.constant 0.000000e+00 : f32
    %60 = vector.shape_cast %43 : vector<1x256xi1> to vector<1x256xi1>
    %61 = vector.broadcast %60 : vector<1x256xi1> to vector<12x256xi1>
    %62 = vector.broadcast %cst_31 : f32 to vector<12x256xf32>
    %63 = arith.select %61, %59, %62 : vector<12x256xi1>, vector<12x256xf32>
    %64 = tpu.concatenate %51, %55, %63 in 0 : vector<12x256xf32>, vector<12x256xf32>, vector<12x256xf32> -> vector<36x256xf32>
    %c0_32 = arith.constant 0 : index
    %c0_33 = arith.constant 0 : index
    %c0_34 = arith.constant 0 : index
    %65 = vector.load %arg4[%c0_32, %c0_33, %c0_34] : memref<4x16x36xbf16, #tpu.memory_space<vmem>>, vector<1x16x36xbf16>
    %66 = vector.shape_cast %65 : vector<1x16x36xbf16> to vector<16x36xbf16>
    %67 = arith.truncf %64 : vector<36x256xf32> to vector<36x256xbf16>
    %cst_35 = arith.constant dense<0.000000e+00> : vector<16x256xf32>
    %68 = tpu.matmul %66, %67, %cst_35 {dimension_numbers = #tpu.dot_dimension_numbers<[1], [0], [0], [1], [0, 0, 1, 1], [], []>} : vector<16x36xbf16>, vector<36x256xbf16>, vector<16x256xf32> -> vector<16x256xf32>
    %69 = arith.addf %39, %68 : vector<16x256xf32>
    %c2_i32 = arith.constant 2 : i32
    %70 = vector.broadcast %c2_i32 : i32 to vector<1x256xi32>
    %71 = arith.cmpi sge, %38, %70 : vector<1x256xi32>
    %c14_i32 = arith.constant 14 : i32
    %72 = vector.broadcast %c14_i32 : i32 to vector<1x256xi32>
    %73 = arith.cmpi slt, %38, %72 : vector<1x256xi32>
    %c0_36 = arith.constant 0 : index
    %c94 = arith.constant 94 : index
    %74 = vector.load %arg6[%c0_36, %c94] : memref<4x452xf32, #tpu.memory_space<vmem>>, vector<4x256xf32>
    %c0_37 = arith.constant 0 : index
    %c126 = arith.constant 126 : index
    %75 = vector.load %arg6[%c0_37, %c126] : memref<4x452xf32, #tpu.memory_space<vmem>>, vector<4x256xf32>
    %c0_38 = arith.constant 0 : index
    %c158 = arith.constant 158 : index
    %76 = vector.load %arg6[%c0_38, %c158] : memref<4x452xf32, #tpu.memory_space<vmem>>, vector<4x256xf32>
    %77 = tpu.concatenate %74, %75, %76 in 0 : vector<4x256xf32>, vector<4x256xf32>, vector<4x256xf32> -> vector<12x256xf32>
    %cst_39 = arith.constant 0.000000e+00 : f32
    %78 = vector.shape_cast %71 : vector<1x256xi1> to vector<1x256xi1>
    %79 = vector.broadcast %78 : vector<1x256xi1> to vector<12x256xi1>
    %80 = vector.broadcast %cst_39 : f32 to vector<12x256xf32>
    %81 = arith.select %79, %77, %80 : vector<12x256xi1>, vector<12x256xf32>
    %c0_40 = arith.constant 0 : index
    %c96 = arith.constant 96 : index
    %82 = vector.load %arg6[%c0_40, %c96] : memref<4x452xf32, #tpu.memory_space<vmem>>, vector<4x256xf32>
    %c0_41 = arith.constant 0 : index
    %c128_42 = arith.constant 128 : index
    %83 = vector.load %arg6[%c0_41, %c128_42] : memref<4x452xf32, #tpu.memory_space<vmem>>, vector<4x256xf32>
    %c0_43 = arith.constant 0 : index
    %c160 = arith.constant 160 : index
    %84 = vector.load %arg6[%c0_43, %c160] : memref<4x452xf32, #tpu.memory_space<vmem>>, vector<4x256xf32>
    %85 = tpu.concatenate %82, %83, %84 in 0 : vector<4x256xf32>, vector<4x256xf32>, vector<4x256xf32> -> vector<12x256xf32>
    %c0_44 = arith.constant 0 : index
    %c98 = arith.constant 98 : index
    %86 = vector.load %arg6[%c0_44, %c98] : memref<4x452xf32, #tpu.memory_space<vmem>>, vector<4x256xf32>
    %c0_45 = arith.constant 0 : index
    %c130 = arith.constant 130 : index
    %87 = vector.load %arg6[%c0_45, %c130] : memref<4x452xf32, #tpu.memory_space<vmem>>, vector<4x256xf32>
    %c0_46 = arith.constant 0 : index
    %c162 = arith.constant 162 : index
    %88 = vector.load %arg6[%c0_46, %c162] : memref<4x452xf32, #tpu.memory_space<vmem>>, vector<4x256xf32>
    %89 = tpu.concatenate %86, %87, %88 in 0 : vector<4x256xf32>, vector<4x256xf32>, vector<4x256xf32> -> vector<12x256xf32>
    %cst_47 = arith.constant 0.000000e+00 : f32
    %90 = vector.shape_cast %73 : vector<1x256xi1> to vector<1x256xi1>
    %91 = vector.broadcast %90 : vector<1x256xi1> to vector<12x256xi1>
    %92 = vector.broadcast %cst_47 : f32 to vector<12x256xf32>
    %93 = arith.select %91, %89, %92 : vector<12x256xi1>, vector<12x256xf32>
    %94 = tpu.concatenate %81, %85, %93 in 0 : vector<12x256xf32>, vector<12x256xf32>, vector<12x256xf32> -> vector<36x256xf32>
    %c1_48 = arith.constant 1 : index
    %c0_49 = arith.constant 0 : index
    %c0_50 = arith.constant 0 : index
    %95 = vector.load %arg4[%c1_48, %c0_49, %c0_50] : memref<4x16x36xbf16, #tpu.memory_space<vmem>>, vector<1x16x36xbf16>
    %96 = vector.shape_cast %95 : vector<1x16x36xbf16> to vector<16x36xbf16>
    %97 = arith.truncf %94 : vector<36x256xf32> to vector<36x256xbf16>
    %cst_51 = arith.constant dense<0.000000e+00> : vector<16x256xf32>
    %98 = tpu.matmul %96, %97, %cst_51 {dimension_numbers = #tpu.dot_dimension_numbers<[1], [0], [0], [1], [0, 0, 1, 1], [], []>} : vector<16x36xbf16>, vector<36x256xbf16>, vector<16x256xf32> -> vector<16x256xf32>
    %99 = arith.addf %69, %98 : vector<16x256xf32>
    %c3_i32 = arith.constant 3 : i32
    %100 = vector.broadcast %c3_i32 : i32 to vector<1x256xi32>
    %101 = arith.cmpi sge, %38, %100 : vector<1x256xi32>
    %c13_i32 = arith.constant 13 : i32
    %102 = vector.broadcast %c13_i32 : i32 to vector<1x256xi32>
    %103 = arith.cmpi slt, %38, %102 : vector<1x256xi32>
    %c0_52 = arith.constant 0 : index
    %c77 = arith.constant 77 : index
    %104 = vector.load %arg6[%c0_52, %c77] : memref<4x452xf32, #tpu.memory_space<vmem>>, vector<4x256xf32>
    %c0_53 = arith.constant 0 : index
    %c125 = arith.constant 125 : index
    %105 = vector.load %arg6[%c0_53, %c125] : memref<4x452xf32, #tpu.memory_space<vmem>>, vector<4x256xf32>
    %c0_54 = arith.constant 0 : index
    %c173 = arith.constant 173 : index
    %106 = vector.load %arg6[%c0_54, %c173] : memref<4x452xf32, #tpu.memory_space<vmem>>, vector<4x256xf32>
    %107 = tpu.concatenate %104, %105, %106 in 0 : vector<4x256xf32>, vector<4x256xf32>, vector<4x256xf32> -> vector<12x256xf32>
    %cst_55 = arith.constant 0.000000e+00 : f32
    %108 = vector.shape_cast %101 : vector<1x256xi1> to vector<1x256xi1>
    %109 = vector.broadcast %108 : vector<1x256xi1> to vector<12x256xi1>
    %110 = vector.broadcast %cst_55 : f32 to vector<12x256xf32>
    %111 = arith.select %109, %107, %110 : vector<12x256xi1>, vector<12x256xf32>
    %c0_56 = arith.constant 0 : index
    %c80 = arith.constant 80 : index
    %112 = vector.load %arg6[%c0_56, %c80] : memref<4x452xf32, #tpu.memory_space<vmem>>, vector<4x256xf32>
    %c0_57 = arith.constant 0 : index
    %c128_58 = arith.constant 128 : index
    %113 = vector.load %arg6[%c0_57, %c128_58] : memref<4x452xf32, #tpu.memory_space<vmem>>, vector<4x256xf32>
    %c0_59 = arith.constant 0 : index
    %c176 = arith.constant 176 : index
    %114 = vector.load %arg6[%c0_59, %c176] : memref<4x452xf32, #tpu.memory_space<vmem>>, vector<4x256xf32>
    %115 = tpu.concatenate %112, %113, %114 in 0 : vector<4x256xf32>, vector<4x256xf32>, vector<4x256xf32> -> vector<12x256xf32>
    %c0_60 = arith.constant 0 : index
    %c83 = arith.constant 83 : index
    %116 = vector.load %arg6[%c0_60, %c83] : memref<4x452xf32, #tpu.memory_space<vmem>>, vector<4x256xf32>
    %c0_61 = arith.constant 0 : index
    %c131 = arith.constant 131 : index
    %117 = vector.load %arg6[%c0_61, %c131] : memref<4x452xf32, #tpu.memory_space<vmem>>, vector<4x256xf32>
    %c0_62 = arith.constant 0 : index
    %c179 = arith.constant 179 : index
    %118 = vector.load %arg6[%c0_62, %c179] : memref<4x452xf32, #tpu.memory_space<vmem>>, vector<4x256xf32>
    %119 = tpu.concatenate %116, %117, %118 in 0 : vector<4x256xf32>, vector<4x256xf32>, vector<4x256xf32> -> vector<12x256xf32>
    %cst_63 = arith.constant 0.000000e+00 : f32
    %120 = vector.shape_cast %103 : vector<1x256xi1> to vector<1x256xi1>
    %121 = vector.broadcast %120 : vector<1x256xi1> to vector<12x256xi1>
    %122 = vector.broadcast %cst_63 : f32 to vector<12x256xf32>
    %123 = arith.select %121, %119, %122 : vector<12x256xi1>, vector<12x256xf32>
    %124 = tpu.concatenate %111, %115, %123 in 0 : vector<12x256xf32>, vector<12x256xf32>, vector<12x256xf32> -> vector<36x256xf32>
    %c2_64 = arith.constant 2 : index
    %c0_65 = arith.constant 0 : index
    %c0_66 = arith.constant 0 : index
    %125 = vector.load %arg4[%c2_64, %c0_65, %c0_66] : memref<4x16x36xbf16, #tpu.memory_space<vmem>>, vector<1x16x36xbf16>
    %126 = vector.shape_cast %125 : vector<1x16x36xbf16> to vector<16x36xbf16>
    %127 = arith.truncf %124 : vector<36x256xf32> to vector<36x256xbf16>
    %cst_67 = arith.constant dense<0.000000e+00> : vector<16x256xf32>
    %128 = tpu.matmul %126, %127, %cst_67 {dimension_numbers = #tpu.dot_dimension_numbers<[1], [0], [0], [1], [0, 0, 1, 1], [], []>} : vector<16x36xbf16>, vector<36x256xbf16>, vector<16x256xf32> -> vector<16x256xf32>
    %129 = arith.addf %99, %128 : vector<16x256xf32>
    %c4_i32 = arith.constant 4 : i32
    %130 = vector.broadcast %c4_i32 : i32 to vector<1x256xi32>
    %131 = arith.cmpi sge, %38, %130 : vector<1x256xi32>
    %c12_i32 = arith.constant 12 : i32
    %132 = vector.broadcast %c12_i32 : i32 to vector<1x256xi32>
    %133 = arith.cmpi slt, %38, %132 : vector<1x256xi32>
    %c0_68 = arith.constant 0 : index
    %c60 = arith.constant 60 : index
    %134 = vector.load %arg6[%c0_68, %c60] : memref<4x452xf32, #tpu.memory_space<vmem>>, vector<4x256xf32>
    %c0_69 = arith.constant 0 : index
    %c124 = arith.constant 124 : index
    %135 = vector.load %arg6[%c0_69, %c124] : memref<4x452xf32, #tpu.memory_space<vmem>>, vector<4x256xf32>
    %c0_70 = arith.constant 0 : index
    %c188 = arith.constant 188 : index
    %136 = vector.load %arg6[%c0_70, %c188] : memref<4x452xf32, #tpu.memory_space<vmem>>, vector<4x256xf32>
    %137 = tpu.concatenate %134, %135, %136 in 0 : vector<4x256xf32>, vector<4x256xf32>, vector<4x256xf32> -> vector<12x256xf32>
    %cst_71 = arith.constant 0.000000e+00 : f32
    %138 = vector.shape_cast %131 : vector<1x256xi1> to vector<1x256xi1>
    %139 = vector.broadcast %138 : vector<1x256xi1> to vector<12x256xi1>
    %140 = vector.broadcast %cst_71 : f32 to vector<12x256xf32>
    %141 = arith.select %139, %137, %140 : vector<12x256xi1>, vector<12x256xf32>
    %c0_72 = arith.constant 0 : index
    %c64 = arith.constant 64 : index
    %142 = vector.load %arg6[%c0_72, %c64] : memref<4x452xf32, #tpu.memory_space<vmem>>, vector<4x256xf32>
    %c0_73 = arith.constant 0 : index
    %c128_74 = arith.constant 128 : index
    %143 = vector.load %arg6[%c0_73, %c128_74] : memref<4x452xf32, #tpu.memory_space<vmem>>, vector<4x256xf32>
    %c0_75 = arith.constant 0 : index
    %c192 = arith.constant 192 : index
    %144 = vector.load %arg6[%c0_75, %c192] : memref<4x452xf32, #tpu.memory_space<vmem>>, vector<4x256xf32>
    %145 = tpu.concatenate %142, %143, %144 in 0 : vector<4x256xf32>, vector<4x256xf32>, vector<4x256xf32> -> vector<12x256xf32>
    %c0_76 = arith.constant 0 : index
    %c68 = arith.constant 68 : index
    %146 = vector.load %arg6[%c0_76, %c68] : memref<4x452xf32, #tpu.memory_space<vmem>>, vector<4x256xf32>
    %c0_77 = arith.constant 0 : index
    %c132 = arith.constant 132 : index
    %147 = vector.load %arg6[%c0_77, %c132] : memref<4x452xf32, #tpu.memory_space<vmem>>, vector<4x256xf32>
    %c0_78 = arith.constant 0 : index
    %c196 = arith.constant 196 : index
    %148 = vector.load %arg6[%c0_78, %c196] : memref<4x452xf32, #tpu.memory_space<vmem>>, vector<4x256xf32>
    %149 = tpu.concatenate %146, %147, %148 in 0 : vector<4x256xf32>, vector<4x256xf32>, vector<4x256xf32> -> vector<12x256xf32>
    %cst_79 = arith.constant 0.000000e+00 : f32
    %150 = vector.shape_cast %133 : vector<1x256xi1> to vector<1x256xi1>
    %151 = vector.broadcast %150 : vector<1x256xi1> to vector<12x256xi1>
    %152 = vector.broadcast %cst_79 : f32 to vector<12x256xf32>
    %153 = arith.select %151, %149, %152 : vector<12x256xi1>, vector<12x256xf32>
    %154 = tpu.concatenate %141, %145, %153 in 0 : vector<12x256xf32>, vector<12x256xf32>, vector<12x256xf32> -> vector<36x256xf32>
    %c3 = arith.constant 3 : index
    %c0_80 = arith.constant 0 : index
    %c0_81 = arith.constant 0 : index
    %155 = vector.load %arg4[%c3, %c0_80, %c0_81] : memref<4x16x36xbf16, #tpu.memory_space<vmem>>, vector<1x16x36xbf16>
    %156 = vector.shape_cast %155 : vector<1x16x36xbf16> to vector<16x36xbf16>
    %157 = arith.truncf %154 : vector<36x256xf32> to vector<36x256xbf16>
    %cst_82 = arith.constant dense<0.000000e+00> : vector<16x256xf32>
    %158 = tpu.matmul %156, %157, %cst_82 {dimension_numbers = #tpu.dot_dimension_numbers<[1], [0], [0], [1], [0, 0, 1, 1], [], []>} : vector<16x36xbf16>, vector<36x256xbf16>, vector<16x256xf32> -> vector<16x256xf32>
    %159 = arith.addf %129, %158 : vector<16x256xf32>
    %c0_83 = arith.constant 0 : index
    %c0_84 = arith.constant 0 : index
    %c0_85 = arith.constant 0 : index
    %160 = vector.load %arg5[%c0_83, %c0_84, %c0_85] : memref<1x16x256xf32, #tpu.memory_space<vmem>>, vector<1x16x256xf32>
    %161 = vector.shape_cast %160 : vector<1x16x256xf32> to vector<16x256xf32>
    %162 = vector.shape_cast %159 : vector<16x256xf32> to vector<1x16x256xf32>
    tpu.vector_store %arg5[%c0_83, %c0_84, %c0_85], %162 {strides = array<i32>} : memref<1x16x256xf32, #tpu.memory_space<vmem>>, vector<1x16x256xf32>,
    return
  }
  func.func @transform_0(%arg0: i32) -> (i32, i32, i32) {
    %c0_i32 = arith.constant 0 : i32
    %c0_i32_0 = arith.constant 0 : i32
    %c0_i32_1 = arith.constant 0 : i32
    return %arg0, %c0_i32, %c0_i32_0 : i32, i32, i32
  }
  func.func @transform_1(%arg0: i32) -> (i32, i32) {
    %c0_i32 = arith.constant 0 : i32
    %c0_i32_0 = arith.constant 0 : i32
    %c0_i32_1 = arith.constant 0 : i32
    return %c0_i32, %c0_i32_0 : i32, i32
  }
  func.func @transform_2(%arg0: i32) -> (i32, i32) {
    %c0_i32 = arith.constant 0 : i32
    %c0_i32_0 = arith.constant 0 : i32
    %c0_i32_1 = arith.constant 0 : i32
    return %c0_i32, %c0_i32_0 : i32, i32
  }
  func.func @transform_3(%arg0: i32) -> (i32, i32, i32) {
    %c0_i32 = arith.constant 0 : i32
    %c0_i32_0 = arith.constant 0 : i32
    %c0_i32_1 = arith.constant 0 : i32
    %c0_i32_2 = arith.constant 0 : i32
    return %c0_i32, %c0_i32_0, %c0_i32_1 : i32, i32, i32
  }
  func.func @transform_4(%arg0: i32) -> (i32, i32, i32) {
    %c0_i32 = arith.constant 0 : i32
    %c0_i32_0 = arith.constant 0 : i32
    %c0_i32_1 = arith.constant 0 : i32
    return %arg0, %c0_i32, %c0_i32_0 : i32, i32, i32
  }
}

</mosaic_0001>

<bundles_post_ra>
// kernel: mdc_forward.1
= control target key start
LH: loop header
LB: loop body
LE: loop exit
PB: predicated region body
PF: predicated region fallthrough
CT: control target
= control target key end

     0   :  { %s1721_s15 = smov 0   ;;  %s2469_s0 = inlined_call_operand.vmem [shape: f32[2,4,256], index: 0, kind: input, shape index: {}]   ;;  %s2470_s1 = inlined_call_operand.vmem [shape: bf16[4,4], index: 1, kind: input, shape index: {}]   ;;  %s2471_s2 = inlined_call_operand.vmem [shape: f32[4,3], index: 2, kind: input, shape index: {}]   ;;  %s2472_s3 = inlined_call_operand.vmem [shape: bf16[4,16,36], index: 3, kind: input, shape index: {}]   ;;  %s2473_s4 = inlined_call_operand.vmem [shape: f32[2,16,256], index: 4, kind: output, shape index: {}]  }
   0x1 LB: > { %s1263_s16 = sadd.s32 4294967295, %s1674_s15   ;;  %p1267_p0 = scmp.ge.s32.totalorder %s1674_s15, 1  ;;  %s1674_s15 = sphi %s1721_s15, %s14_s15  }
   0x2   : > { %p162_p1 = scmp.lt.s32.totalorder %s1674_s15, 3 }
   0x4   : > { %p163_p2 = pnand %p1267_p0, %p162_p1 }
   0x5   : > { %p188_p3 = scmp.lt.s32.totalorder (!%p163_p2), %s1263_s16, 1  ;;  %v2474_v0 = vmov (!%p163_p2), 0   ;;  %v258_v1 = vld [vmem:[%s2471_s2] sm:$0xf] (!%p163_p2)  ;;  %v1677_v2 = vmov (!%p163_p2), 2   ;;  %vm2478_vm0 = vcmask (!%p163_p2), 1041408  }
   0x6   : > { %166 = sbr.rel (%p163_p2) target bundleno = 904 (0x388), region = 36  ;;  %249 = vmatprep.mubr.bf16.mxu0 (!%p163_p2), %v2474_v0  ;;  %1384 = vset.pattern.permute.xlu0 (!%p163_p2), %v2474_v0  ;;  %v1678_v4 = vmov (!%p163_p2), 1   ;;  %v199_v9 = vld [vmem:[%s2470_s1] sm:$0x3] (!%p163_p2)  ;;  %vm206_vm1 = vcmask (!%p163_p2), 31744   ;;  %vm283_vm2 = vcmask (!%p163_p2), 551936  }
   0x7   : > { %261 = vperm.xlu0 (!%p163_p2), %1384, %v258_v1   ;;  %1386 = vset.pattern.permute.xlu1 (!%p163_p2), %v1677_v2  ;;  %v1679_v10 = vmov (!%p163_p2), 0.0   ;;  %s1680_s25 = smov (!%p163_p2), 80   ;;  %s1681_s26 = smov (!%p163_p2), 96   ;;  %vm764_vm5 = vcmask (!%p163_p2), 654336   ;;  %vm352_vm6 = vcmask (!%p163_p2), 785408   ;;  %vm355_vm7 = vcmask (!%p163_p2), 1043456  }
   0x8   : > { %275 = vperm.xlu1 (!%p163_p2), %1386, %v258_v1   ;;  %965 = vmatprep.mubr.bf16.mxu1 (!%p163_p2), %v2474_v0  ;;  %282 = vst [vmem:[#allocation2] sm:$0xf] (!%p163_p2), %v1679_v10  ;;  %284 = vst.msk [vmem:[#allocation2 + $0xc] sm:$0xf] (!%p163_p2), %vm283_vm2, %v1679_v10  ;;  %s1682_s27 = smov (!%p163_p2), 64   ;;  %s1683_s28 = smov (!%p163_p2), 32  }
   0x9   : > { %s1684_s29 = smov (!%p163_p2), 112   ;;  %vm503_vm8 = vcmask (!%p163_p2), 523264   ;;  %vm609_vm9 = vcmask (!%p163_p2), 261120   ;;  %s1685_s30 = smov (!%p163_p2), 34   ;;  %vm337_vm10 = vcmask (!%p163_p2), 916480   ;;  %vm528_vm11 = vcmask (!%p163_p2), 277504  }
   0xa   : > { %s1686_s5 = smov (!%p163_p2), 51   ;;  %s1687_s6 = smov (!%p163_p2), 30   ;;  %vm1695_vm14 = vmmov (!%p163_p2), 1   ;;  %vm574_vm2 = vcmask (!%p163_p2), 244736  }
   0xb   : > { %1385 = vset.pattern.permute.xlu0 (!%p163_p2), %v1678_v4  ;;  %s1688_s7 = smov (!%p163_p2), 17   ;;  %s1689_s8 = smov (!%p163_p2), 68  }
   0xc   : > { %267 = vperm.xlu0 (!%p163_p2), %1385, %v258_v1   ;;  %s1690_s9 = smov (!%p163_p2), 48   ;;  %s1691_s10 = smov (!%p163_p2), 45  }
   0xd   : > { %s2501_s16 = smov (!%p188_p3, %s1263_s16), 1  ;;  %s1692_s11 = smov 15  }
   0xe   : > { %s1342_s19 = sshll.u32 %s2501_s16, 3  ;;  %s1693_s12 = smov 60  }
   0xf   : > { %s192_s22 = scalar_lea.vmem %s2469_s0, %s1342_s19  ;;  %v1747_v22 = vld [vmem:[#allocation2 + $0xc] sm:$0xf]  ;;  %s1694_s13 = smov 16  }
  0x10   : > { %v200_v3 = vld [vmem:[%s192_s22] sm:$0xff]  ;;  %1652 = vset.pattern.permute.xlu0 %v1677_v2  ;;  %v828_v26 = vcombine.low %v1747_v22, %v1747_v22  ;;  %v324_v35 = vld [vmem:[#allocation2 + $0xc] sm:$0xf]  ;;  %s1343_s24 = sshll.u32 %s2501_s16, 5 }
  0x11   : > { %v202_v5 = vcombine.high %v200_v3, %v200_v3  ;;  %v204_v6 = vpack.c.bf16 %v200_v3, %v200_v3  ;;  %v403_v44 = vcombine.low %v324_v35, %v324_v35 }
  0x13   : > { %v205_v7 = vpack.c.bf16 %v202_v5, %v202_v5  ;;  %v212_v8 = vsel %vm2478_vm0, %v204_v6, 0 }
  0x15   : > { %1272 = vmatprep.subr.msk.bf16.mxu0 %vm2478_vm0, %v205_v7 }
  0x16   : > { %218 = vmatpush1.bf16.msra.mxu0 %v212_v8 }
  0x19   : > { %1273 = vmatmul.mubr.msk.bf16.vlgmr.msra.gmra.mrb[0].mxu0 %vm206_vm1, %v199_v9 }
  0x1a   : > { %676 = vmatprep.mubr.bf16.mxu0 %v2474_v0 }
  0x86   : > { %v262_v11 = vpop.permute.xlu0 %261 }
  0x87   : > { %v276_v18 = vpop.permute.xlu1 %275 }
  0x8b   : > { %v268_v13 = vpop.permute.xlu0 %267 }
  0xec   : > { %v251_v12 = vpop.f32.mrb[0].mxu0 }
  0xed   : > { %v264_v14 = vmul.f32 %v262_v11, %v251_v12  ;;  %v253_v15 = vpop.f32.mrb[1].mxu0 }
  0xee   : > { %v265_v16 = vmul.f32 %v262_v11, %v253_v15  ;;  %v255_v17 = vpop.f32.mrb[2].mxu0 }
  0xef   : > { %v270_v19 = vadd.f32 %v268_v13, %v264_v14  ;;  %v256_v20 = vpop.f32.mrb[3].mxu0 }
  0xf0   : > { %v271_v21 = vadd.f32 %v268_v13, %v265_v16 }
  0xf1   : > { %vm272_vm3 = vcmp.gt.f32.partialorder %v270_v19, 0.0  ;;  %v278_v23 = vmul.f32 %v276_v18, %v270_v19 }
  0xf2   : > { %vm273_vm4 = vcmp.gt.f32.partialorder %v271_v21, 0.0  ;;  %v279_v24 = vmul.f32 %v276_v18, %v271_v21 }
  0xf3   : > { %v280_v25 = vsel %vm272_vm3, %v270_v19, %v278_v23 }
  0xf4   : > { %v281_v27 = vsel %vm273_vm4, %v271_v21, %v279_v24  ;;  %v1666_v30 = vcombine.low %v280_v25, %v280_v25  ;;  %v1850_v21 = vld [vmem:[#allocation2 + $0xc] sm:$0xf] }
  0xf5   : > { %v1751_v28 = vcombine.low %v280_v25, %v281_v27  ;;  %v1755_v31 = vcombine.low %v281_v27, %v281_v27 }
  0xf6   : > { %v1407_v40 = vpack.i.bf16 %v1666_v30, %v324_v35 }
  0xf7   : > { %289 = vst [vmem:[#allocation2 + $0x4] sm:$0xff] %v1751_v28  ;;  %v1387_v29 = vpack.i.bf16 %v828_v26, %v1751_v28  ;;  %v1392_v32 = vpack.i.bf16 %v1666_v30, %v1751_v28  ;;  %v1402_v33 = vpack.i.bf16 %v1755_v31, %v1751_v28  ;;  %v1397_v34 = vpack.i.bf16 %v1751_v28, %v1666_v30 }
  0xf8   : > { %v1442_v49 = vpack.i.bf16 %v324_v35, %v1755_v31 }
  0xf9   : > { %1388 = vrot.lane.b32.xlu0 %v1387_v29, %s1680_s25  ;;  %1393 = vrot.lane.b32.xlu1 %v1392_v32, %s1681_s26 }
  0xfd   : > { %1403 = vrot.lane.b32.xlu0 %v1402_v33, %s1682_s27  ;;  %1398 = vrot.lane.b32.xlu1 %v1397_v34, %s1680_s25 }
  0xfe   : > { %v1762_v36 = vld [vmem:[#allocation2 + $0x8] sm:$0xf]  ;;  %v1768_v39 = vld [vmem:[#allocation2] sm:$0xff] }
  0xff   : > { %v1764_v37 = vld [vmem:[#allocation2 + $0x8] sm:$0xf]  ;;  %v330_v38 = vcombine.low %v1762_v36, %v1762_v36  ;;  %v329_v43 = vcombine.low %v1768_v39, %v1768_v39  ;;  %v1804_v60 = vcombine.high %v1768_v39, %v1768_v39 }
 0x100   : > { %v757_v41 = vcombine.low %v1764_v37, %v1764_v37  ;;  %v1780_v47 = vld [vmem:[#allocation2 + $0x8] sm:$0xf] }
 0x101   : > { %1413 = vrot.lane.b32.xlu0 %v1402_v33, %s1683_s28  ;;  %1408 = vrot.lane.b32.xlu1 %v1407_v40, %s1682_s27  ;;  %v1417_v42 = vpack.i.bf16 %v330_v38, %v1768_v39  ;;  %v1778_v46 = vpack.i.bf16 %v403_v44, %v329_v43  ;;  %v1432_v48 = vpack.i.bf16 %v1666_v30, %v329_v43 }
 0x102   : > { %v1422_v45 = vpack.i.bf16 %v757_v41, %v1768_v39  ;;  %v993_v50 = vcombine.low %v1780_v47, %v1780_v47  ;;  %v1053_v38 = vcombine.low %v1850_v21, %v1850_v21 }
 0x104   : > { %v1452_v51 = vpack.i.bf16 %v993_v50, %v1768_v39 }
 0x105   : > { %1418 = vrot.lane.b32.xlu0 %v1417_v42, %s1681_s26  ;;  %1423 = vrot.lane.b32.xlu1 %v1422_v45, %s1680_s25 }
 0x109   : > { %1428 = vrot.lane.b32.xlu0 %v1778_v46, %s1681_s26  ;;  %1433 = vrot.lane.b32.xlu1 %v1432_v48, %s1680_s25 }
 0x10d   : > { %1443 = vrot.lane.b32.xlu0 %v1442_v49, %s1681_s26  ;;  %1438 = vrot.lane.b32.xlu1 %v1397_v34, %s1684_s29 }
 0x111   : > { %1453 = vrot.lane.b32.xlu0 %v1452_v51, %s1682_s27  ;;  %1448 = vrot.lane.b32.xlu1 %v1417_v42, %s1684_s29 }
 0x115   : > { %1468 = vrot.lane.b32.xlu0 %v1432_v48, %s1682_s27 }
 0x16b   : > { %v1791_v52 = vpop.permute.xlu0 %1388  ;;  %v1394_v55 = vpop.permute.xlu1 %1393 }
 0x16c   : > { %v1391_v53 = vunpack.i.h.bf16 %v1791_v52  ;;  %v1390_v54 = vunpack.i.l.bf16 %v1791_v52  ;;  %v1396_v57 = vunpack.i.h.bf16 %v1394_v55  ;;  %v1800_v58 = vunpack.i.l.bf16 %v1394_v55 }
 0x16e   : > { %v1798_v56 = vsel %vm764_vm5, %v1390_v54, %v1391_v53  ;;  %v543_v61 = vsel %vm352_vm6, %v1396_v57, %v1800_v58  ;;  %v1810_v62 = vsel %vm355_vm7, %v1768_v39, %v1396_v57  ;;  %v1823_v4 = vsel %vm355_vm7, %v1762_v36, %v1800_v58 }
 0x16f   : > { %v1404_v59 = vpop.permute.xlu0 %1403  ;;  %v1814_v2 = vpop.permute.xlu1 %1398  ;;  %v1818_v3 = vsel %vm355_vm7, %v1804_v60, %v543_v61  ;;  %v588_v9 = vrot.slane %v1810_v62, 4  ;;  %v590_v10 = vrot.slane %v1823_v4, 4 }
 0x170   : > { %v1812_v63 = vunpack.i.l.bf16 %v1404_v59  ;;  %v1406_v1 = vunpack.i.h.bf16 %v1404_v59  ;;  %v1401_v5 = vunpack.i.h.bf16 %v1814_v2  ;;  %v1400_v6 = vunpack.i.l.bf16 %v1814_v2 }
 0x171   : > { %v589_v7 = vrot.slane %v1818_v3, 4  ;;  %v1866_v30 = vpack.i.bf16 %v588_v9, %v590_v10 }
 0x172   : > { %v591_v11 = vrot.slane %v1812_v63, 4  ;;  %v820_v13 = vsel %vm764_vm5, %v1400_v6, %v1401_v5  ;;  %v824_v14 = vsel %vm355_vm7, %v1768_v39, %v1400_v6  ;;  %v504_v20 = vsel %vm503_vm8, %v1812_v63, %v1406_v1 }
 0x173   : > { %v1828_v8 = vpop.permute.xlu0 %1413  ;;  %v1841_v16 = vsel %vm355_vm7, %v1804_v60, %v820_v13  ;;  %v878_v17 = vrot.slane %v824_v14, 4  ;;  %v1846_v19 = vpop.permute.xlu1 %1408  ;;  %v1457_v26 = vpack.i.bf16 %v589_v7, %v1747_v22  ;;  %v593_v42 = vrot.slane %v504_v20, 4 }
 0x174   : > { %v1416_v15 = vunpack.i.h.bf16 %v1828_v8  ;;  %v1844_v18 = vunpack.i.l.bf16 %v1828_v8  ;;  %v879_v23 = vrot.slane %v1841_v16, 4  ;;  %v1411_v24 = vunpack.i.h.bf16 %v1846_v19 }
 0x175   : > { %v1410_v25 = vunpack.i.l.bf16 %v1846_v19  ;;  %v1870_v33 = vsel %vm355_vm7, %v588_v9, %v591_v11  ;;  %1458 = vrot.lane.b32.xlu1 %v1457_v26, %s1683_s28  ;;  %v1907_v11 = vsel %vm355_vm7, %v589_v7, %v593_v42  ;;  %v1914_v19 = vsel %vm355_vm7, %v1764_v37, %v1798_v56 }
 0x176   : > { %v1862_v29 = vsel %vm609_vm9, %v1844_v18, %v1416_v15  ;;  %v881_v32 = vrot.slane %v1844_v18, 4  ;;  %v1874_v22 = vsel %vm503_vm8, %v1411_v24, %v1812_v63  ;;  %v1051_v0 = vsel %vm355_vm7, %v1780_v47, %v1812_v63 }
 0x177   : > { %v1856_v27 = vpop.permute.xlu0 %1418  ;;  %v1424_v40 = vpop.permute.xlu1 %1423  ;;  %v1882_v41 = vsel %vm503_vm8, %v1406_v1, %v1410_v25  ;;  %v883_v43 = vrot.slane %v1862_v29, 4  ;;  %v1472_v1 = vpack.i.bf16 %v1053_v38, %v1751_v28 }
 0x178   : > { %v1421_v34 = vunpack.i.h.bf16 %v1856_v27  ;;  %v1420_v35 = vunpack.i.l.bf16 %v1856_v27  ;;  %v1886_v44 = vsel %vm355_vm7, %v878_v17, %v881_v32  ;;  %v1426_v48 = vunpack.i.h.bf16 %v1424_v40 }
 0x179   : > { %v1425_v49 = vunpack.i.l.bf16 %v1424_v40  ;;  %v1890_v50 = vpack.i.bf16 %v1882_v41, %v504_v20  ;;  %v884_v55 = vsel %vm355_vm7, %v879_v23, %v883_v43  ;;  %1463 = vrot.lane.b32.xlu1 %v1778_v46, %s1684_s29  ;;  %v1918_v20 = vsel %vm355_vm7, %v1764_v37, %v1401_v5 }
 0x17a   : > { %v493_v45 = vsel %vm352_vm6, %v1420_v35, %v1421_v34  ;;  %v1904_v9 = vpack.i.bf16 %v884_v55, %v878_v17  ;;  %v880_v42 = vrot.slane %v1918_v20, 4 }
 0x17b   : > { %v1429_v51 = vpop.permute.xlu0 %1428  ;;  %v507_v53 = vsel %vm355_vm7, %v1804_v60, %v493_v45  ;;  %v766_v57 = vsel %vm764_vm5, %v1425_v49, %v1426_v48  ;;  %1478 = vrot.lane.b32.xlu0 %v1890_v50, %s1685_s30  ;;  %v1434_v2 = vpop.permute.xlu1 %1433 }
 0x17c   : > { %v1431_v59 = vunpack.i.h.bf16 %v1429_v51  ;;  %v1430_v61 = vunpack.i.l.bf16 %v1429_v51  ;;  %v1487_v6 = vpack.i.bf16 %v507_v53, %v1812_v63  ;;  %v1436_v13 = vunpack.i.h.bf16 %v1434_v2 }
 0x17d   : > { %v1435_v14 = vunpack.i.l.bf16 %v1434_v2  ;;  %v782_v7 = vsel %vm355_vm7, %v1804_v60, %v766_v57  ;;  %1473 = vrot.lane.b32.xlu1 %v1472_v1, %s1682_s27 }
 0x17e   : > { %v552_v46 = vsel %vm352_vm6, %v1800_v58, %v1431_v59  ;;  %v492_v17 = vsel %vm352_vm6, %v1430_v61, %v1420_v35  ;;  %v835_v27 = vsel %vm764_vm5, %v1436_v13, %v1390_v54  ;;  %v595_v35 = vrot.slane %v1882_v41, 4 }
 0x17f   : > { %v1444_v25 = vpop.permute.xlu0 %1443  ;;  %v1925_v26 = vsel %vm355_vm7, %v1762_v36, %v552_v46  ;;  %v765_v56 = vsel %vm764_vm5, %v1435_v14, %v1425_v49  ;;  %1488 = vrot.lane.b32.xlu0 %v1487_v6, %s1685_s30  ;;  %v1439_v38 = vpop.permute.xlu1 %1438  ;;  %v1942_v54 = vsel %vm355_vm7, %v1804_v60, %v835_v27  ;;  %v1949_v41 = vsel %vm355_vm7, %v1764_v37, %v1426_v48 }
 0x180   : > { %v1446_v5 = vunpack.i.h.bf16 %v1444_v25  ;;  %v1445_v32 = vunpack.i.l.bf16 %v1444_v25  ;;  %v1936_v40 = vsel %vm355_vm7, %v1768_v39, %v765_v56  ;;  %v1512_v52 = vpack.i.bf16 %v1925_v26, %v1818_v3 }
 0x181   : > { %v1945_v43 = vunpack.i.h.bf16 %v1439_v38  ;;  %v1440_v45 = vunpack.i.l.bf16 %v1439_v38  ;;  %v1953_v49 = vsel %vm355_vm7, %v1768_v39, %v1411_v24  ;;  %v1497_v53 = vpack.i.bf16 %v782_v7, %v1844_v18 }
 0x182   : > { %v506_v55 = vsel %vm355_vm7, %v1768_v39, %v492_v17  ;;  %v1507_v57 = vpack.i.bf16 %v1936_v40, %v1949_v41  ;;  %v508_v59 = vsel %vm355_vm7, %v1762_v36, %v1421_v34  ;;  %v354_v37 = vsel %vm352_vm6, %v1445_v32, %v1446_v5 }
 0x183   : > { %v1955_v51 = vpop.permute.xlu0 %1453  ;;  %v1517_v48 = vpack.i.bf16 %v1914_v19, %v1942_v54  ;;  %v1106_v24 = vrot.slane %v1751_v28, 4  ;;  %v396_v61 = vsel %vm337_vm10, %v1440_v45, %v1945_v43  ;;  %1498 = vrot.lane.b32.xlu0 %v1497_v53, %s1686_s5  ;;  %v353_v1 = vsel %vm352_vm6, %v1800_v58, %v1445_v32  ;;  %v1984_v14 = vpop.permute.xlu1 %1448 }
 0x184   : > { %v1975_v2 = vsel %vm355_vm7, %v1768_v39, %v1436_v13  ;;  %v1980_v34 = vsel %vm355_vm7, %v590_v10, %v595_v35  ;;  %v1103_v6 = vrot.slane %v1953_v49, 4  ;;  %v1456_v46 = vunpack.i.h.bf16 %v1955_v51 }
 0x185   : > { %v1502_v17 = vpack.i.bf16 %v506_v55, %v508_v59  ;;  %v1110_v25 = vrot.slane %v1850_v21, 4  ;;  %v449_v27 = vrot.slane %v354_v37, 4  ;;  %v1997_v10 = vpack.i.bf16 %v880_v42, %v879_v23 }
 0x186   : > { %v1455_v56 = vunpack.i.l.bf16 %v1955_v51  ;;  %v447_v32 = vrot.slane %v353_v1, 4  ;;  %v2003_v35 = vsel %vm355_vm7, %v1804_v60, %v396_v61  ;;  %v1451_v38 = vunpack.i.h.bf16 %v1984_v14 }
 0x187   : > { %v1987_v7 = vpop.permute.xlu0 %1468  ;;  %v1450_v49 = vunpack.i.l.bf16 %v1984_v14  ;;  %1503 = vrot.lane.b32.xlu0 %v1502_v17, %s1685_s30  ;;  %v2010_v16 = vsel %vm355_vm7, %v1768_v39, %v1440_v45  ;;  %v2015_v23 = vsel %vm355_vm7, %v1762_v36, %v1945_v43  ;;  %v1010_v53 = vsel %vm355_vm7, %v1780_v47, %v1456_v46 }
 0x188   : > { %v1470_v5 = vunpack.i.l.bf16 %v1987_v7  ;;  %v442_v59 = vrot.slane %v2010_v16, 4  ;;  %v443_v45 = vrot.slane %v2003_v35, 4  ;;  %v2476_v14 = vrot.slane %v2015_v23, 4 }
 0x189   : > { %v1050_v17 = vsel %vm355_vm7, %v1804_v60, %v1874_v22  ;;  %v445_v55 = vrot.slane %v1800_v58, 4  ;;  %v339_v13 = vsel %vm337_vm10, %v1450_v49, %v1451_v38  ;;  %v2043_v22 = vsel %vm355_vm7, %v1103_v6, %v1106_v24 }
 0x18a   : > { %v1000_v51 = vsel %vm503_vm8, %v1470_v5, %v1455_v56  ;;  %v1104_v4 = vrot.slane %v1050_v17, 4  ;;  %v2040_v12 = vsel %vm355_vm7, %v2476_v14, %v449_v27  ;;  %v448_v17 = vsel %vm355_vm7, %v443_v45, %v447_v32 }
 0x18b   : > { %v1008_v61 = vsel %vm355_vm7, %v1768_v39, %v1000_v51  ;;  %1533 = vrot.lane.b32.xlu0 %v1890_v50, %s1687_s6  ;;  %v1105_v51 = vrot.slane %v1051_v0, 4  ;;  %v1001_v14 = vsel %vm503_vm8, %v1455_v56, %v1456_v46  ;;  %v1471_v19 = vunpack.i.h.bf16 %v1987_v7 }
 0x18c   : > { %v1567_v5 = vpack.i.bf16 %v1008_v61, %v1010_v53  ;;  %v2045_v53 = vpack.i.bf16 %v354_v37, %v353_v1  ;;  %v2048_v61 = vsel %vm355_vm7, %v442_v59, %v445_v55  ;;  %v1109_v0 = vsel %vm355_vm7, %v1104_v4, %v1755_v31 }
 0x18d   : > { %v2055_v50 = vpack.i.bf16 %v1105_v51, %v1104_v4  ;;  %v1607_v27 = vpack.i.bf16 %v2048_v61, %v2040_v12  ;;  %v2060_v24 = vsel %vm355_vm7, %v1105_v51, %v1110_v25  ;;  %v2062_v37 = vpack.i.bf16 %v448_v17, %v442_v59 }
 0x18e   : > { %v357_v1 = vsel %vm355_vm7, %v1804_v60, %v339_v13  ;;  %v1617_v55 = vpack.i.bf16 %v2043_v22, %v2060_v24  ;;  %v2068_v32 = vpack.i.bf16 %v1109_v0, %v1103_v6  ;;  %v1009_v25 = vsel %vm355_vm7, %v1804_v60, %v1001_v14 }
 0x18f   : > { %1543 = vrot.lane.b32.xlu0 %v2045_v53, %s1688_s7  ;;  %v1552_v4 = vpack.i.bf16 %v357_v1, %v1800_v58  ;;  %v1557_v59 = vpack.i.bf16 %v1009_v25, %v1751_v28  ;;  %v2480_v40 = vpack.i.bf16 %v1844_v18, %v1975_v2  ;;  %vm378_vm5 = vcmask 138240  }
 0x190   : > { %vm803_vm6 = vcmask 416768  }
 0x193   : > { %1553 = vrot.lane.b32.xlu0 %v1552_v4, %s1688_s7 }
 0x197   : > { %1558 = vrot.lane.b32.xlu0 %v1557_v59, %s1689_s8 }
 0x1e7   : > { %v2077_v13 = vpop.permute.xlu1 %1458 }
 0x1e8   : > { %v1460_v6 = vunpack.i.l.bf16 %v2077_v13 }
 0x1ea   : > { %v780_v46 = vsel %vm609_vm9, %v1416_v15, %v1460_v6  ;;  %v358_v15 = vsel %vm355_vm7, %v1762_v36, %v1451_v38 }
 0x1eb   : > { %v1464_v56 = vpop.permute.xlu1 %1463  ;;  %v1482_v51 = vpack.i.bf16 %v780_v46, %v1862_v29  ;;  %v885_v17 = vrot.slane %v780_v46, 4 }
 0x1ec   : > { %v1465_v0 = vunpack.i.l.bf16 %v1464_v56  ;;  %v1466_v29 = vunpack.i.h.bf16 %v1464_v56 }
 0x1ed   : > { %1483 = vrot.lane.b32.xlu1 %v1482_v51, %s1686_s5  ;;  %v886_v14 = vsel %vm355_vm7, %v880_v42, %v885_v17 }
 0x1ee   : > { %v338_v1 = vsel %vm337_vm10, %v1465_v0, %v1450_v49  ;;  %v1577_v4 = vpack.i.bf16 %v1886_v44, %v886_v14  ;;  %v2479_v44 = vpack.i.bf16 %v1812_v63, %v1810_v62  ;;  %v406_v3 = vsel %vm337_vm10, %v1945_v43, %v1466_v29 }
 0x1ef   : > { %v356_v8 = vsel %vm355_vm7, %v1768_v39, %v338_v1  ;;  %v2481_v63 = vpack.i.bf16 %v1980_v34, %v1907_v11  ;;  %v2482_v11 = vpack.i.bf16 %v1800_v58, %v2010_v16 }
 0x1f0   : > { %v1562_v25 = vpack.i.bf16 %v356_v8, %v358_v15 }
 0x1f1   : > { %1493 = vrot.lane.b32.xlu1 %v1866_v30, %s1683_s28  ;;  %v1474_v30 = vpop.permute.xlu1 %1473 }
 0x1f2   : > { %1563 = vrot.lane.b32.xlu0 %v1562_v25, %s1688_s7  ;;  %v1476_v20 = vunpack.i.h.bf16 %v1474_v30  ;;  %v1475_v26 = vunpack.i.l.bf16 %v1474_v30 }
 0x1f4   : > { %v1061_v62 = vsel %vm503_vm8, %v1475_v26, %v1476_v20 }
 0x1f5   : > { %1508 = vrot.lane.b32.xlu1 %v1507_v57, %s1686_s5  ;;  %v1067_v18 = vsel %vm355_vm7, %v1780_v47, %v1061_v62  ;;  %v2483_v47 = vrot.slane %v2015_v23, 4 }
 0x1f6   : > { %1568 = vrot.lane.b32.xlu0 %v1567_v5, %s1689_s8 }
 0x1f9   : > { %1513 = vrot.lane.b32.xlu1 %v1512_v52, %s1687_s6  ;;  %v1060_v52 = vsel %vm503_vm8, %v1471_v19, %v1475_v26 }
 0x1fa   : > { %1578 = vrot.lane.b32.xlu0 %v1577_v4, %s1690_s9  ;;  %v1066_v54 = vsel %vm355_vm7, %v1804_v60, %v1060_v52  ;;  %v1582_v60 = vpack.i.bf16 %v2483_v47, %v443_v45 }
 0x1fb   : > { %v1612_v42 = vpack.i.bf16 %v1067_v18, %v1066_v54 }
 0x1fd   : > { %1518 = vrot.lane.b32.xlu1 %v1517_v48, %s1691_s10  ;;  %v290_v48 = vlaneseq }
 0x1fe   : > { %603 = vrot.lane.b32.xlu0 %v1870_v33, %s1683_s28  ;;  %v408_v33 = vsel %vm355_vm7, %v1762_v36, %v406_v3  ;;  %v1547_v36 = vpack.i.bf16 %v1850_v21, %v1755_v31  ;;  %v1065_v31 = vsel %vm355_vm7, %v1768_v39, %v1471_v19  ;;  %v1479_v21 = vpop.permute.xlu0 %1478 }
 0x1ff   : > { %v1637_v58 = vpack.i.bf16 %v1751_v28, %v1065_v31  ;;  %v291_v34 = vand.u32 127, %v290_v48  ;;  %v1481_v28 = vunpack.i.h.bf16 %v1479_v21  ;;  %v1480_v38 = vunpack.i.l.bf16 %v1479_v21 }
 0x201   : > { %1523 = vrot.lane.b32.xlu1 %v2479_v44, %s1687_s6  ;;  %v292_v39 = vadd.s32 128, %v291_v34  ;;  %v532_v45 = vsel %vm528_vm11, %v1480_v38, %v1481_v28 }
 0x202   : > { %1593 = vrot.lane.b32.xlu0 %v1904_v9, %s1690_s9  ;;  %v1602_v9 = vpack.i.bf16 %v408_v33, %v2003_v35  ;;  %v1489_v12 = vpop.permute.xlu0 %1488  ;;  %v2169_v35 = vand.u32 15, %v291_v34 }
 0x203   : > { %v1490_v49 = vunpack.i.l.bf16 %v1489_v12 }
 0x204   : > { %vm482_vm13 = vcmp.ge.s32.totalorder %v2169_v35, 2  ;;  %vm484_vm4 = vcmp.lt.s32.totalorder %v2169_v35, 14 }
 0x205   : > { %1528 = vrot.lane.b32.xlu1 %v2480_v40, %s1691_s10  ;;  %v531_v5 = vsel %vm528_vm11, %v1490_v49, %v1480_v38  ;;  %vm1280_vm1 = vmpackc.low %vm1695_vm14, %vm482_vm13 }
 0x206   : > { %1598 = vrot.lane.b32.xlu0 %v2481_v63, %s1683_s28  ;;  %v2161_v43 = vpop.permute.xlu0 %1498  ;;  %v539_v46 = vsel %vm482_vm13, %v531_v5, 0.0 }
 0x207   : > { %v1500_v28 = vunpack.i.l.bf16 %v2161_v43 }
 0x209   : > { %1538 = vrot.lane.b32.xlu1 %v1482_v51, %s1691_s10 }
 0x20a   : > { %1603 = vrot.lane.b32.xlu0 %v1602_v9, %s1692_s11  ;;  %v1504_v41 = vpop.permute.xlu0 %1503 }
 0x20b   : > { %v1506_v22 = vunpack.i.h.bf16 %v1504_v41 }
 0x20d   : > { %1548 = vrot.lane.b32.xlu1 %v1547_v36, %s1689_s8 }
 0x20e   : > { %1613 = vrot.lane.b32.xlu0 %v1612_v42, %s1693_s12  ;;  %v1534_v57 = vpop.permute.xlu0 %1533 }
 0x20f   : > { %v1536_v30 = vunpack.i.h.bf16 %v1534_v57  ;;  %v1535_v44 = vunpack.i.l.bf16 %v1534_v57 }
 0x211   : > { %1573 = vrot.lane.b32.xlu1 %v1997_v10, %s1690_s9  ;;  %v2167_v10 = vand.u32 15, %v292_v39  ;;  %v578_v33 = vsel %vm574_vm2, %v1535_v44, %v1536_v30  ;;  %v1501_v39 = vunpack.i.h.bf16 %v2161_v43 }
 0x212   : > { %1623 = vrot.lane.b32.xlu0 %v2482_v11, %s1692_s11  ;;  %v2163_v2 = vpop.permute.xlu0 %1543 }
 0x213   : > { %vm483_vm12 = vcmp.ge.s32.totalorder %v2167_v10, 2  ;;  %vm485_vm3 = vcmp.lt.s32.totalorder %v2167_v10, 14  ;;  %v1545_v57 = vunpack.i.l.bf16 %v2163_v2  ;;  %vm745_vm13 = vcmp.ge.s32.totalorder %v2167_v10, 3 }
 0x214   : > { %v540_v6 = vsel %vm483_vm12, %v532_v45, 0.0  ;;  %vm1277_vm15 = vmpackc.low %vm1695_vm14, %vm483_vm12  ;;  %v586_v47 = vsel %vm485_vm3, %v578_v33, 0.0  ;;  %vm899_vm12 = vcmask 392192  }
 0x215   : > { %1583 = vrot.lane.b32.xlu1 %v1582_v60, %s1694_s13  ;;  %vm1283_vm10 = vmpackc.low %vm485_vm3, %vm1695_vm14  ;;  %v628_v38 = vpack.c.bf16 %v586_v47, %v586_v47  ;;  %vm747_vm3 = vcmp.lt.s32.totalorder %v2167_v10, 13 }
 0x216   : > { %1643 = vrot.lane.b32.xlu0 %v2045_v53, %s1692_s11  ;;  %v2165_v7 = vpop.permute.xlu0 %1553  ;;  %v1505_v53 = vunpack.i.l.bf16 %v1504_v41  ;;  %v1546_v41 = vunpack.i.h.bf16 %v2163_v2 }
 0x219   : > { %1588 = vrot.lane.b32.xlu1 %v2055_v50, %s1682_s27  ;;  %v1461_v50 = vunpack.i.h.bf16 %v2077_v13 }
 0x21a   : > { %v2173_v23 = vpop.permute.xlu0 %1558 }
 0x21d   : > { %1608 = vrot.lane.b32.xlu1 %v1607_v27, %s1694_s13 }
 0x221   : > { %1618 = vrot.lane.b32.xlu1 %v1617_v55, %s1682_s27  ;;  %v1491_v55 = vunpack.i.h.bf16 %v1489_v12 }
 0x223   : > { %v529_v56 = vsel %vm528_vm11, %v1506_v22, %v1491_v55  ;;  %v530_v51 = vsel %vm528_vm11, %v1491_v55, %v1505_v53  ;;  %vm1286_vm11 = vmpackc.low %vm484_vm4, %vm1695_vm14  ;;  %v382_v53 = vsel %vm378_vm5, %v1545_v57, %v1546_v41 }
 0x225   : > { %1628 = vrot.lane.b32.xlu1 %v2062_v37, %s1694_s13 }
 0x229   : > { %1633 = vrot.lane.b32.xlu1 %v2068_v32, %s1682_s27  ;;  %s197_s27 = scalar_lea.vmem %s2473_s4, %s1343_s24 }
 0x22d   : > { %1638 = vrot.lane.b32.xlu1 %v1637_v58, %s1693_s12 }
 0x231   : > { %1648 = vrot.lane.b32.xlu1 %v1547_v36, %s1693_s12 }
 0x25f   : > { %v2171_v16 = vpop.permute.xlu1 %1483 }
 0x260   : > { %v1486_v36 = vunpack.i.h.bf16 %v2171_v16  ;;  %v1485_v42 = vunpack.i.l.bf16 %v2171_v16 }
 0x262   : > { %v807_v16 = vsel %vm803_vm6, %v1485_v42, %v1486_v36  ;;  %v806_v43 = vsel %vm803_vm6, %v1500_v28, %v1485_v42 }
 0x263   : > { %v1494_v61 = vpop.permute.xlu1 %1493 }
 0x264   : > { %v1496_v27 = vunpack.i.h.bf16 %v1494_v61  ;;  %v1495_v24 = vunpack.i.l.bf16 %v1494_v61  ;;  %v2180_v37 = vpop.permute.xlu0 %1563  ;;  %v1556_v61 = vunpack.i.h.bf16 %v2165_v7 }
 0x266   : > { %v610_v32 = vsel %vm609_vm9, %v1496_v27, %v1461_v50  ;;  %v611_v59 = vsel %vm609_vm9, %v1461_v50, %v1495_v24  ;;  %v815_v27 = vsel %vm745_vm13, %v807_v16, 0.0 }
 0x267   : > { %v2190_v13 = vpop.permute.xlu1 %1508  ;;  %v619_v17 = vsel %vm355_vm7, %v540_v6, %v611_v59  ;;  %v618_v0 = vsel %vm355_vm7, %v539_v46, %v610_v32  ;;  %v1662_v46 = vld [vmem:[%s2472_s3 + $0x8] sm:$0xff]  }
 0x268   : > { %v2197_v14 = vpop.permute.xlu0 %1568  ;;  %v1278_v1 = vpack.c.bf16 %v619_v17, %v530_v51  ;;  %v1281_v4 = vpack.c.bf16 %v618_v0, %v529_v56  ;;  %v1511_v45 = vunpack.i.h.bf16 %v2190_v13  ;;  %v1510_v5 = vunpack.i.l.bf16 %v2190_v13 }
 0x269   : > { %v1565_v56 = vunpack.i.l.bf16 %v2180_v37 }
 0x26a   : > { %1279 = vmatprep.subr.msk.bf16.mxu0 %vm1277_vm15, %v1278_v1  ;;  %vm318_vm15 = vcmp.ge.s32.totalorder %v2167_v10, 1  ;;  %v805_v17 = vsel %vm803_vm6, %v1501_v39, %v1510_v5  ;;  %v804_v0 = vsel %vm803_vm6, %v1511_v45, %v1501_v39  ;;  %vm2284_vm6 = vmpackc.low %vm1695_vm14, %vm745_vm13 }
 0x26b   : > { %v1514_v8 = vpop.permute.xlu1 %1513  ;;  %1282 = vmatpush1.bf16.msk.msra.mxu0 %vm1280_vm1, %v1281_v4  ;;  %vm744_vm1 = vcmp.ge.s32.totalorder %v2169_v35, 3  ;;  %vm2304_vm13 = vmpackc.low %vm747_vm3, %vm1695_vm14 }
 0x26c   : > { %v2202_v15 = vpop.permute.xlu0 %1578  ;;  %v1516_v19 = vunpack.i.h.bf16 %v1514_v8  ;;  %v1515_v40 = vunpack.i.l.bf16 %v1514_v8  ;;  %v814_v6 = vsel %vm744_vm1, %v806_v43, 0.0 }
 0x26d   : > { %v1580_v51 = vunpack.i.l.bf16 %v2202_v15  ;;  %v1581_v41 = vunpack.i.h.bf16 %v2202_v15 }
 0x26e   : > { %v576_v11 = vsel %vm574_vm2, %v1515_v40, %v1516_v19 }
 0x26f   : > { %v2204_v25 = vpop.permute.xlu1 %1518 }
 0x270   : > { %v604_v29 = vpop.permute.xlu0 %603  ;;  %v1521_v30 = vunpack.i.h.bf16 %v2204_v25 }
 0x273   : > { %v1524_v3 = vpop.permute.xlu1 %1523 }
 0x274   : > { %v1526_v20 = vunpack.i.h.bf16 %v1524_v3  ;;  %v2206_v26 = vpop.permute.xlu0 %1593  ;;  %v1525_v52 = vunpack.i.l.bf16 %v1524_v3 }
 0x275   : > { %v1596_v50 = vunpack.i.h.bf16 %v2206_v26  ;;  %v1595_v1 = vunpack.i.l.bf16 %v2206_v26 }
 0x276   : > { %v577_v63 = vsel %vm574_vm2, %v1526_v20, %v1535_v44  ;;  %v575_v60 = vsel %vm574_vm2, %v1525_v52, %v1515_v40  ;;  %vm463_vm2 = vcmask 130048   ;;  %v1520_v44 = vunpack.i.l.bf16 %v2204_v25 }
 0x277   : > { %v2209_v62 = vpop.permute.xlu1 %1528  ;;  %v585_v12 = vsel %vm484_vm4, %v577_v63, 0.0  ;;  %vm746_vm4 = vcmp.lt.s32.totalorder %v2169_v35, 13  ;;  %v903_v3 = vsel %vm899_vm12, %v1596_v50, %v1580_v51  ;;  %v902_v45 = vsel %vm899_vm12, %v1581_v41, %v1596_v50 }
 0x278   : > { %v1599_v9 = vpop.permute.xlu0 %1598  ;;  %v627_v49 = vpack.c.bf16 %v585_v12, %v585_v12  ;;  %v1531_v4 = vunpack.i.h.bf16 %v2209_v62  ;;  %v1530_v20 = vunpack.i.l.bf16 %v2209_v62  ;;  %v390_v12 = vsel %vm318_vm15, %v382_v53, 0.0 }
 0x279   : > { %v1601_v54 = vunpack.i.h.bf16 %v1599_v9  ;;  %v1600_v18 = vunpack.i.l.bf16 %v1599_v9  ;;  %v1561_v51 = vunpack.i.h.bf16 %v2173_v23 }
 0x27a   : > { %v639_v59 = vsel %vm2478_vm0, %v627_v49, 0 }
 0x27b   : > { %v612_v31 = vsel %vm609_vm9, %v604_v29, %v1600_v18  ;;  %v613_v58 = vsel %vm609_vm9, %v1600_v18, %v1601_v54  ;;  %v1539_v21 = vpop.permute.xlu1 %1538  ;;  %vm862_vm9 = vcmask 367616   ;;  %v2486_v18 = vmov 0  }
 0x27c   : > { %v1284_v48 = vpack.c.bf16 %v576_v11, %v613_v58  ;;  %v1287_v34 = vpack.c.bf16 %v575_v60, %v612_v31  ;;  %v1541_v24 = vunpack.i.h.bf16 %v1539_v21  ;;  %v1540_v55 = vunpack.i.l.bf16 %v1539_v21  ;;  %v2253_v32 = vpop.permute.xlu0 %1603 }
 0x27d   : > { %v380_v31 = vsel %vm378_vm5, %v1556_v61, %v1565_v56  ;;  %v864_v58 = vsel %vm862_vm9, %v1520_v44, %v1521_v30  ;;  %v1566_v30 = vunpack.i.h.bf16 %v2180_v37  ;;  %v1606_v2 = vunpack.i.h.bf16 %v2253_v32 }
 0x27e   : > { %1285 = vmatprep.subr.msk.bf16.mxu0 %vm1283_vm10, %v1284_v48  ;;  %vm2477_vm10 = vcmask 293888   ;;  %v866_v19 = vsel %vm862_vm9, %v1540_v55, %v1541_v24  ;;  %v865_v26 = vsel %vm862_vm9, %v1531_v4, %v1540_v55  ;;  %v1316_v48 = vpack.c.bf16 %v864_v58, %v903_v3 }
 0x27f   : > { %v2239_v22 = vpop.permute.xlu1 %1548  ;;  %1288 = vmatpush1.bf16.msk.msra.mxu0 %vm1286_vm11, %v1287_v34  ;;  %vm1030_vm11 = vcmask 556032   ;;  %v863_v34 = vsel %vm862_vm9, %v1530_v20, %v1520_v44  ;;  %v874_v15 = vsel %vm747_vm3, %v866_v19, 0.0  ;;  %vm1292_vm9 = vmpackc.low %vm1695_vm14, %vm318_vm15  ;;  %v873_v16 = vsel %vm746_vm4, %v865_v26, 0.0 }
 0x280   : > { %1289 = vmatprep.subr.msk.bf16.mxu0 %vm2478_vm0, %v628_v38  ;;  %v1551_v52 = vunpack.i.h.bf16 %v2239_v22  ;;  %v1550_v63 = vunpack.i.l.bf16 %v2239_v22  ;;  %v2290_v36 = vpop.permute.xlu0 %1613  ;;  %vm981_vm0 = vcmp.ge.s32.totalorder %v2167_v10, 4  ;;  %v1570_v24 = vunpack.i.l.bf16 %v2197_v14 }
 0x281   : > { %v1319_v55 = vpack.c.bf16 %v863_v34, %v902_v45  ;;  %vm1326_vm15 = vmpackc.low %vm1695_vm14, %vm981_vm0  ;;  %v1560_v19 = vunpack.i.l.bf16 %v2173_v23  ;;  %v379_v37 = vsel %vm378_vm5, %v1566_v30, %v1556_v61  ;;  %v1571_v26 = vunpack.i.h.bf16 %v2197_v14 }
 0x282   : > { %v1034_v28 = vsel %vm1030_vm11, %v1550_v63, %v1551_v52 }
 0x283   : > { %v1574_v13 = vpop.permute.xlu1 %1573  ;;  %649 = vmatpush1.bf16.msra.mxu0 %v639_v59  ;;  %v1042_v56 = vsel %vm981_vm0, %v1034_v28, 0.0  ;;  %vm1087_vm0 = vcmask 490496  }
 0x284   : > { %v1576_v8 = vunpack.i.h.bf16 %v1574_v13  ;;  %v1575_v29 = vunpack.i.l.bf16 %v1574_v13  ;;  %v2341_v59 = vpop.permute.xlu0 %1623 }
 0x285   : > { %v1626_v61 = vunpack.i.h.bf16 %v2341_v59 }
 0x286   : > { %v900_v40 = vsel %vm899_vm12, %v1595_v1, %v1575_v29  ;;  %v901_v33 = vsel %vm899_vm12, %v1575_v29, %v1576_v8  ;;  %1290 = vmatmul.mubr.msk.bf16.vlgmr.msra.gmra.mrb[4].mxu0 %vm2477_vm10, %v1662_v46  ;;  %vm1312_vm10 = vmpackc.low %vm1695_vm14, %vm744_vm1  ;;  %v917_v46 = vpack.c.bf16 %v873_v16, %v873_v16  ;;  %vm2489_vm12 = vcmask 1041408   ;;  %v1663_v29 = vld [vmem:[%s2472_s3 + $0x10] sm:$0xff]  }
 0x287   : > { %v2278_v9 = vpop.permute.xlu1 %1583  ;;  %v909_v25 = vsel %vm355_vm7, %v815_v27, %v901_v33  ;;  %v908_v54 = vsel %vm355_vm7, %v814_v6, %v900_v40  ;;  %733 = vmatprep.mubr.bf16.mxu0 %v2486_v18  ;;  %vm1318_vm1 = vmpackc.low %vm746_vm4, %vm1695_vm14  ;;  %v1555_v27 = vunpack.i.l.bf16 %v2165_v7  ;;  %v918_v6 = vpack.c.bf16 %v874_v15, %v874_v15 }
 0x288   : > { %v1586_v42 = vunpack.i.h.bf16 %v2278_v9  ;;  %v1585_v11 = vunpack.i.l.bf16 %v2278_v9  ;;  %v1310_v47 = vpack.c.bf16 %v909_v25, %v805_v17  ;;  %v1313_v60 = vpack.c.bf16 %v908_v54, %v804_v0  ;;  %vm2490_vm3 = vmmov %vm2489_vm12  ;;  %v1644_v3 = vpop.permute.xlu0 %1643 }
 0x289   : > { %v1032_v0 = vsel %vm1030_vm11, %v1561_v51, %v1570_v24  ;;  %v381_v1 = vsel %vm378_vm5, %v1555_v27, %v1545_v57  ;;  %v928_v4 = vsel %vm2490_vm3, %v917_v46, 0  ;;  %vm317_vm4 = vcmp.ge.s32.totalorder %v2169_v35, 1 }
 0x28a   : > { %v465_v39 = vsel %vm463_vm2, %v1585_v11, %v1586_v42  ;;  %1311 = vmatprep.subr.msk.bf16.mxu1 %vm2284_vm6, %v1310_v47  ;;  %v1605_v57 = vunpack.i.l.bf16 %v2253_v32  ;;  %v389_v20 = vsel %vm317_vm4, %v381_v1, 0.0  ;;  %vm320_vm6 = vcmp.lt.s32.totalorder %v2167_v10, 15  ;;  %vm1295_vm5 = vmpackc.low %vm1695_vm14, %vm317_vm4 }
 0x28b   : > { %v2321_v38 = vpop.permute.xlu1 %1588  ;;  %1314 = vmatpush1.bf16.msk.msra.mxu1 %vm1312_vm10, %v1313_v60  ;;  %v473_v49 = vsel %vm355_vm7, %v390_v12, %v465_v39  ;;  %vm428_vm10 = vcmask 121856   ;;  %v1646_v40 = vunpack.i.h.bf16 %v1644_v3  ;;  %v1645_v32 = vunpack.i.l.bf16 %v1644_v3 }
 0x28c   : > { %v1591_v5 = vunpack.i.h.bf16 %v2321_v38  ;;  %v1590_v43 = vunpack.i.l.bf16 %v2321_v38  ;;  %1317 = vmatprep.subr.msk.bf16.mxu1 %vm2304_vm13, %v1316_v48  ;;  %v1293_v53 = vpack.c.bf16 %v473_v49, %v380_v31  ;;  %vm319_vm13 = vcmp.lt.s32.totalorder %v2169_v35, 15 }
 0x28d   : > { %v430_v54 = vsel %vm428_vm10, %v1605_v57, %v1606_v2  ;;  %v1616_v42 = vunpack.i.h.bf16 %v2290_v36  ;;  %v1615_v7 = vunpack.i.l.bf16 %v2290_v36  ;;  %v1033_v47 = vsel %vm1030_vm11, %v1560_v19, %v1550_v63  ;;  %vm1301_vm4 = vmpackc.low %vm319_vm13, %vm1695_vm14  ;;  %v1665_v19 = vld [vmem:[%s2472_s3 + $0x18] sm:$0xff]  }
 0x28e   : > { %v1125_v50 = vsel %vm503_vm8, %v1590_v43, %v1591_v5  ;;  %1294 = vmatprep.subr.msk.bf16.mxu0 %vm1292_vm9, %v1293_v53  ;;  %vm2491_vm9 = vcmask 293888   ;;  %v1625_v60 = vunpack.i.l.bf16 %v2341_v59  ;;  %v431_v31 = vsel %vm428_vm10, %v1626_v61, %v1645_v32 }
 0x28f   : > { %v1609_v13 = vpop.permute.xlu1 %1608  ;;  %1320 = vmatpush1.bf16.msk.msra.mxu1 %vm1318_vm1, %v1319_v55  ;;  %v1133_v17 = vsel %vm355_vm7, %v1042_v56, %v1125_v50  ;;  %vm980_vm1 = vcmp.ge.s32.totalorder %v2169_v35, 4  ;;  %v432_v58 = vsel %vm428_vm10, %v1645_v32, %v1646_v40  ;;  %vm982_vm3 = vcmp.lt.s32.totalorder %v2169_v35, 12 }
 0x290   : > { %1321 = vmatprep.subr.msk.bf16.mxu1 %vm2489_vm12, %v918_v6  ;;  %v1327_v8 = vpack.c.bf16 %v1133_v17, %v1032_v0  ;;  %vm983_vm12 = vcmp.lt.s32.totalorder %v2167_v10, 12  ;;  %v1610_v52 = vunpack.i.l.bf16 %v1609_v13  ;;  %v1611_v21 = vunpack.i.h.bf16 %v1609_v13 }
 0x291   : > { %v1041_v34 = vsel %vm980_vm1, %v1033_v47, 0.0  ;;  %v440_v15 = vsel %vm320_vm6, %v432_v58, 0.0  ;;  %v439_v16 = vsel %vm319_vm13, %v431_v31, 0.0  ;;  %v1031_v38 = vsel %vm1030_vm11, %v1571_v26, %v1561_v51  ;;  %vm1332_vm11 = vmpackc.low %vm983_vm12, %vm1695_vm14 }
 0x292   : > { %v1089_v45 = vsel %vm1087_vm0, %v1615_v7, %v1616_v42  ;;  %v429_v5 = vsel %vm428_vm10, %v1625_v60, %v1605_v57  ;;  %v481_v50 = vpack.c.bf16 %v440_v15, %v440_v15  ;;  %v480_v6 = vpack.c.bf16 %v439_v16, %v439_v16  ;;  %vm1335_vm10 = vmpackc.low %vm982_vm3, %vm1695_vm14 }
 0x293   : > { %v2366_v44 = vpop.permute.xlu1 %1618  ;;  %938 = vmatpush1.bf16.msra.mxu1 %v928_v4 }
 0x294   : > { %1328 = vmatprep.subr.msk.bf16.mxu1 %vm1326_vm15, %v1327_v8  ;;  %v1620_v22 = vunpack.i.l.bf16 %v2366_v44  ;;  %vm1298_vm15 = vmpackc.low %vm320_vm6, %vm1695_vm14  ;;  %v1621_v27 = vunpack.i.h.bf16 %v2366_v44  ;;  %v1664_v8 = vld [vmem:[%s2472_s3] sm:$0xff]  }
 0x296   : > { %1322 = vmatmul.mubr.msk.bf16.vlgmr.msra.gmra.mrb[0].mxu1 %vm2491_vm9, %v1663_v29 }
 0x297   : > { %v1629_v33 = vpop.permute.xlu1 %1628  ;;  %1189 = vmatprep.mubr.bf16.mxu1 %v2486_v18 }
 0x298   : > { %v1631_v25 = vunpack.i.h.bf16 %v1629_v33  ;;  %v1630_v62 = vunpack.i.l.bf16 %v1629_v33 }
 0x29a   : > { %v467_v18 = vsel %vm463_vm2, %v1631_v25, %v1610_v52  ;;  %v464_v14 = vsel %vm463_vm2, %v1630_v62, %v1585_v11  ;;  %v466_v9 = vsel %vm463_vm2, %v1611_v21, %v1631_v25  ;;  %vm2418_vm2 = vmpackc.low %vm1695_vm14, %vm980_vm1 }
 0x29b   : > { %v1634_v36 = vpop.permute.xlu1 %1633  ;;  %v472_v12 = vsel %vm355_vm7, %v389_v20, %v464_v14  ;;  %v1299_v11 = vpack.c.bf16 %v430_v54, %v467_v18  ;;  %v1302_v24 = vpack.c.bf16 %v429_v5, %v466_v9 }
 0x29c   : > { %v1636_v63 = vunpack.i.h.bf16 %v1634_v36  ;;  %v1635_v41 = vunpack.i.l.bf16 %v1634_v36  ;;  %v1296_v48 = vpack.c.bf16 %v472_v12, %v379_v37 }
 0x29e   : > { %v1127_v39 = vsel %vm503_vm8, %v1636_v63, %v1620_v22  ;;  %v1124_v28 = vsel %vm503_vm8, %v1635_v41, %v1590_v43  ;;  %1297 = vmatpush1.bf16.msk.msra.mxu0 %vm1295_vm5, %v1296_v48  ;;  %v1126_v46 = vsel %vm503_vm8, %v1621_v27, %v1636_v63  ;;  %vm2496_vm8 = vmmov %vm2491_vm9 }
 0x29f   : > { %v1639_v43 = vpop.permute.xlu1 %1638  ;;  %1300 = vmatprep.subr.msk.bf16.mxu0 %vm1298_vm15, %v1299_v11  ;;  %v1132_v53 = vsel %vm355_vm7, %v1041_v34, %v1124_v28  ;;  %v1333_v23 = vpack.c.bf16 %v1089_v45, %v1127_v39  ;;  %vm2494_vm7 = vcmask 1041408  }
 0x2a0   : > { %v1640_v55 = vunpack.i.l.bf16 %v1639_v43  ;;  %v1330_v59 = vpack.c.bf16 %v1132_v53, %v1031_v38  ;;  %v1641_v17 = vunpack.i.h.bf16 %v1639_v43  ;;  %vm2495_vm6 = vmmov %vm2494_vm7 }
 0x2a1   : > { %v696_v4 = vsel %vm2495_vm6, %v480_v6, 0  ;;  %vm2497_vm14 = vmmov %vm2495_vm6 }
 0x2a2   : > { %v1088_v56 = vsel %vm1087_vm0, %v1640_v55, %v1615_v7  ;;  %1303 = vmatpush1.bf16.msk.msra.mxu0 %vm1301_vm4, %v1302_v24  ;;  %1331 = vmatpush1.bf16.msk.msra.mxu1 %vm2418_vm2, %v1330_v59  ;;  %vm2498_vm13 = vmmov %vm2495_vm6 }
 0x2a3   : > { %v1336_v51 = vpack.c.bf16 %v1088_v56, %v1126_v46  ;;  %v1649_v13 = vpop.permute.xlu1 %1648  ;;  %1304 = vmatprep.subr.msk.bf16.mxu0 %vm2494_vm7, %v481_v50  ;;  %1334 = vmatprep.subr.msk.bf16.mxu1 %vm1332_vm11, %v1333_v23 }
 0x2a4   : > { %v1651_v0 = vunpack.i.h.bf16 %v1649_v13  ;;  %v1650_v1 = vunpack.i.l.bf16 %v1649_v13 }
 0x2a6   : > { %v1090_v29 = vsel %vm1087_vm0, %v1641_v17, %v1650_v1  ;;  %v1091_v30 = vsel %vm1087_vm0, %v1650_v1, %v1651_v0  ;;  %706 = vmatpush1.bf16.msra.mxu0 %v696_v4  ;;  %1337 = vmatpush1.bf16.msk.msra.mxu1 %vm1335_vm10, %v1336_v51  ;;  %vm2499_vm0 = vmmov %vm2496_vm8 }
 0x2a7   : > { %v1099_v44 = vsel %vm983_vm12, %v1091_v30, 0.0  ;;  %v1098_v3 = vsel %vm982_vm3, %v1090_v29, 0.0 }
 0x2a8   : > { %v1142_v2 = vpack.c.bf16 %v1099_v44, %v1099_v44  ;;  %v1141_v57 = vpack.c.bf16 %v1098_v3, %v1098_v3 }
 0x2a9   : > { %1305 = vmatmul.mubr.msk.bf16.vlgmr.msra.gmra.mrb[4].mxu0 %vm2496_vm8, %v1664_v8 }
 0x2aa   : > { %1338 = vmatprep.subr.msk.bf16.mxu1 %vm2497_vm14, %v1142_v2  ;;  %v1152_v20 = vsel %vm2498_vm13, %v1141_v57, 0 }
 0x2ab   : > { %1162 = vmatpush1.bf16.msra.mxu1 %v1152_v20 }
 0x2ae   : > { %1339 = vmatmul.mubr.msk.bf16.vlgmr.msra.gmra.mrb[0].mxu1 %vm2499_vm0, %v1665_v19 }
 0x37c   : > { %v735_v10 = vpop.f32.mrb[4].mxu0 }
 0x37d   : > { %v737_v37 = vpop.f32.mrb[5].mxu0 }
 0x37e   : > { %v739_v40 = vpop.f32.mrb[6].mxu0 }
 0x37f   : > { %v741_v35 = vpop.f32.mrb[7].mxu0 }
 0x381   : > { %v1191_v32 = vpop.f32.mrb[0].mxu1 }
 0x382   : > { %v1344_v33 = vadd.f32 %v1191_v32, %v735_v10  ;;  %v1193_v26 = vpop.f32.mrb[1].mxu1 }
 0x383   : > { %v1345_v52 = vadd.f32 %v1193_v26, %v737_v37  ;;  %v1195_v25 = vpop.f32.mrb[2].mxu1 }
 0x384   : > { %1204 = vst [vmem:[%s197_s27] sm:$0xff] %v1344_v33  ;;  %v1346_v62 = vadd.f32 %v1195_v25, %v739_v40  ;;  %v1197_v54 = vpop.f32.mrb[3].mxu1 }
 0x385   : > { %1205 = vst [vmem:[%s197_s27 + $0x8] sm:$0xff] %v1345_v52  ;;  %v1347_v42 = vadd.f32 %v1197_v54, %v741_v35 }
 0x386   : > { %1206 = vst [vmem:[%s197_s27 + $0x10] sm:$0xff] %v1346_v62 }
 0x387   : > { %1207 = vst [vmem:[%s197_s27 + $0x18] sm:$0xff] %v1347_v42 }
 0x388 PF: > { %s14_s15 = sadd.s32 1, %s1674_s15  }
 0x389   : > { %p11_p4 = scmp.ge.s32.totalorder %s14_s15, 4  }
 0x38b   :  { %13 = sbr.rel (!%p11_p4) target bundleno = 1 (0x1), region = 69 }

</bundles_post_ra>
